<compile_context>
chip_gen: v7x
topology: tpu7x:2x2x1
jax: 0.10.0
libtpu: 0.0.40
codegen_flags: <defaults>
</compile_context>

<pallas_src>
import functools

import jax
import jax.numpy as jnp
from jax import lax
from jax.experimental import pallas as pl
from jax.experimental.pallas import tpu as pltpu


def cbam_kernel(x_ref, w1t_ref, w2t_ref, mask_ref, wsa_ref, o_ref, *, W):
    # x_ref:    (NB, C, H*W)  lane-dense input block
    # w1t_ref:  (C, Cr)       fc1 weight, pre-transposed
    # w2t_ref:  (Cr, C)       fc2 weight, pre-transposed
    # mask_ref: (14, H*W)     rows 0..6: row-validity masks (dh = kh-3)
    #                         rows 7..13: col-validity masks (dw = kw-3)
    # wsa_ref:  (98,)         7x7 conv weights, flat (c, kh, kw), SMEM scalars
    # o_ref:    (NB, C, H*W)  lane-dense output block
    NB, C, HW = x_ref.shape

    # ------------------ Channel attention (batched over NB) -----------------
    xf = x_ref[...].astype(jnp.float32)                     # (NB, C, HW)
    avg = jnp.mean(xf, axis=2)                              # (NB, C) lane reduce
    mx = jnp.max(xf, axis=2)                                # (NB, C)
    v = jnp.concatenate([avg, mx], axis=0)                  # (2*NB, C)
    h = jnp.maximum(
        jnp.dot(v, w1t_ref[...], preferred_element_type=jnp.float32), 0.0)
    mo = jnp.dot(h, w2t_ref[...], preferred_element_type=jnp.float32)
    ca = jax.nn.sigmoid(mo[:NB] + mo[NB:])                  # (NB, C)

    # Stage y = x * ca through the output block: keeps the (NB, C, HW) f32
    # intermediate in VMEM instead of the vreg file during the conv phase.
    o_ref[...] = (xf * ca[:, :, None]).astype(o_ref.dtype)

    # ------------------ Spatial attention (lane-dense over H*W) -------------
    y = o_ref[...].astype(jnp.float32)                      # streamed readback
    avg_c = jnp.mean(y, axis=1)                             # (NB, HW)
    max_c = jnp.max(y, axis=1)                              # (NB, HW)

    # Hoisted scalar reads of all 2*7*7 conv weights (once per grid step).
    w_avg = [wsa_ref[i] for i in range(49)]
    w_max = [wsa_ref[49 + i] for i in range(49)]

    # Zero-padded 7x7 conv, factored as vertical pass (circular lane roll by
    # dh*W, row mask) then horizontal pass (roll by dw, col mask).  The 0/1
    # masks zero exactly the wrapped entries, reproducing the zero padding.
    hk = [jnp.zeros((NB, HW), jnp.float32) for _ in range(7)]
    for kh in range(7):
        dh = kh - 3
        if dh == 0:
            va, vm = avg_c, max_c
        else:
            rmask = mask_ref[kh].reshape(1, HW)
            shift = (-dh * W) % HW
            va = pltpu.roll(avg_c, shift, axis=1) * rmask
            vm = pltpu.roll(max_c, shift, axis=1) * rmask
        for kw in range(7):
            hk[kw] = hk[kw] + w_avg[kh * 7 + kw] * va + w_max[kh * 7 + kw] * vm

    acc = hk[3]                                             # dw == 0 term
    for kw in range(7):
        dw = kw - 3
        if dw == 0:
            continue
        cmask = mask_ref[7 + kw].reshape(1, HW)
        acc = acc + pltpu.roll(hk[kw], (-dw) % HW, axis=1) * cmask

    sa = jax.nn.sigmoid(acc)                                # (NB, HW)

    # Final elementwise: o = y * sa (sa broadcast over channels), lane-dense.
    o_ref[...] = (o_ref[...].astype(jnp.float32) * sa[:, None, :]
                  ).astype(o_ref.dtype)


def _vmem_budget_bytes():
    # ~half of physical VMEM, capped at 64 MiB: ~28 MiB on v7x (64 MiB phys),
    # ~60 MiB on v5e/v6e (128 MiB phys).  Fallback assumes the small chip.
    try:
        cap = int(pltpu.get_tpu_info().vmem_capacity_bytes)
    except Exception:
        cap = 64 * 2**20
    return int(max(16 * 2**20, min(cap // 2 - (4 << 20), 64 * 2**20)))


def _footprint_bytes(nb, C, HW, itemsize):
    blk = nb * C * HW * itemsize
    blk_f32 = nb * C * HW * 4
    # double-buffered in + out blocks, f32 working copies / conv-map spills,
    # masks, and headroom.
    return 4 * blk + 2 * blk_f32 + 32 * nb * HW * 4 + (1 << 20)


def _choose_nb(N, C, HW, itemsize, budget):
    # Divisors of N, capped at 8 (conv live-set and sublane packing sized for
    # <= 8 batch rows per step).  Prefer: fits budget -> >=2 grid steps
    # (megacore has work) -> even grid length (balanced on 2-core chips) ->
    # largest NB.
    cands = [d for d in range(min(N, 8), 0, -1) if N % d == 0]
    fits = [d for d in cands if _footprint_bytes(d, C, HW, itemsize) <= budget]
    if not fits:
        return 1
    multi = [d for d in fits if N // d >= 2]
    even = [d for d in multi if (N // d) % 2 == 0]
    for group in (even, multi, fits):
        if group:
            return group[0]
    return 1


def cbam_block_pallas(x, w1, w2, wsa):
    N, C, H, W = x.shape
    Cr = w1.shape[0]
    HW = H * W

    budget = _vmem_budget_bytes()
    NB = _choose_nb(N, C, HW, x.dtype.itemsize, budget)
    needed = _footprint_bytes(NB, C, HW, x.dtype.itemsize)
    if needed <= budget:
        vmem_limit = int(min(max(2 * needed, 16 * 2**20), budget))
    else:  # even NB=1 exceeds the soft budget; ask for what we need.
        vmem_limit = int(min(needed + (4 << 20), 100 * 2**20))

    x2 = x.reshape(N, C, HW)          # fold spatial dims onto the lane axis
    w1t = w1.T                        # (C, Cr)
    w2t = w2.T                        # (Cr, C)
    wsa_flat = wsa.reshape(-1)        # (98,) scalars for SMEM

    # Precomputed 0/1 boundary masks for the 7x7 conv (no in-kernel iota or
    # integer div/mod).  Rows 0..6: row validity for dh=kh-3; 7..13: cols.
    pos = jnp.arange(HW, dtype=jnp.int32)
    rows = pos // W
    cols = pos % W
    mrows = [((rows + (kh - 3) >= 0) & (rows + (kh - 3) < H)) for kh in range(7)]
    mcols = [((cols + (kw - 3) >= 0) & (cols + (kw - 3) < W)) for kw in range(7)]
    masks = jnp.stack(mrows + mcols, axis=0).astype(jnp.float32)   # (14, HW)

    kernel = functools.partial(cbam_kernel, W=W)

    out = pl.pallas_call(
        kernel,
        out_shape=jax.ShapeDtypeStruct((N, C, HW), x.dtype),
        grid_spec=pltpu.PrefetchScalarGridSpec(
            num_scalar_prefetch=0,
            grid=(N // NB,),
            in_specs=[
                pl.BlockSpec((NB, C, HW), lambda n: (n, 0, 0)),
                pl.BlockSpec((C, Cr), lambda n: (0, 0)),
                pl.BlockSpec((Cr, C), lambda n: (0, 0)),
                pl.BlockSpec((14, HW), lambda n: (0, 0)),
                pl.BlockSpec(memory_space=pltpu.MemorySpace.SMEM),
            ],
            out_specs=pl.BlockSpec((NB, C, HW), lambda n: (n, 0, 0)),
        ),
        compiler_params=pltpu.CompilerParams(
            dimension_semantics=("parallel",),
            vmem_limit_bytes=vmem_limit),
    )(x2, w1t, w2t, masks, wsa_flat)

    return out.reshape(N, C, H, W)


def cbam_block_ref(x, w1, w2, wsa):
    # Pure-JAX reference mirroring the PyTorch forward (NCHW).
    avg = jnp.mean(x, axis=(2, 3), keepdims=True)
    mx = jnp.max(x, axis=(2, 3), keepdims=True)

    def mlp(v):
        h = jax.nn.relu(jnp.einsum("rc,ncij->nrij", w1, v))
        return jnp.einsum("cr,nrij->ncij", w2, h)

    ca = jax.nn.sigmoid(mlp(avg) + mlp(mx))
    y = x * ca

    avg_c = jnp.mean(y, axis=1, keepdims=True)
    max_c = jnp.max(y, axis=1, keepdims=True)
    s = jnp.concatenate([avg_c, max_c], axis=1)       # (N, 2, H, W)
    conv = lax.conv_general_dilated(
        s, wsa.reshape(1, 2, 7, 7), (1, 1), ((3, 3), (3, 3)),
        dimension_numbers=("NCHW", "OIHW", "NCHW"))
    sa = jax.nn.sigmoid(conv)
    return y * sa


if __name__ == "__main__":
    N, C, H, W = 2, 16, 16, 16
    ratio = 8
    Cr = C // ratio

    key = jax.random.PRNGKey(0)
    kx, k1, k2, k3 = jax.random.split(key, 4)
    x = jax.random.normal(kx, (N, C, H, W), jnp.float32)
    w1 = jax.random.normal(k1, (Cr, C), jnp.float32) * 0.2     # fc1 (1x1 conv)
    w2 = jax.random.normal(k2, (C, Cr), jnp.float32) * 0.2     # fc2 (1x1 conv)
    wsa = jax.random.normal(k3, (2, 7, 7), jnp.float32) * 0.1  # 7x7 conv, 2->1

    out = cbam_block_pallas(x, w1, w2, wsa)
    out = jax.block_until_ready(out)

    ref = cbam_block_ref(x, w1, w2, wsa)
    assert out.shape == ref.shape and out.dtype == ref.dtype
    err = float(jnp.max(jnp.abs(out - ref)))
    assert jnp.allclose(out, ref, rtol=1e-4, atol=1e-5), err

    print("KERNEL_OK")
</pallas_src>

<mosaic_0001>
module attributes {stable_mosaic.version = 11 : i64} {
  func.func @cbam_kernel(%arg0: i32, %arg1: memref<1x16x256xf32, #tpu.memory_space<vmem>>, %arg2: memref<16x2xf32, #tpu.memory_space<vmem>>, %arg3: memref<2x16xf32, #tpu.memory_space<vmem>>, %arg4: memref<14x256xf32, #tpu.memory_space<vmem>>, %arg5: memref<98xf32, #tpu.memory_space<smem>>, %arg6: memref<1x16x256xf32, #tpu.memory_space<vmem>>) attributes {dimension_semantics = [#tpu.dimension_semantics<parallel>], iteration_bounds = array<i64: 2>, scalar_prefetch = 0 : i64, scratch_operands = 0 : i64, tpu.core_type = #tpu.core_type<tc>, window_params = [{transform_indices = @transform_0, window_bounds = array<i64: 1, 16, 256>}, {pipeline_mode = #tpu.pipeline_mode<synchronous>, transform_indices = @transform_1, window_bounds = array<i64: 16, 2>}, {pipeline_mode = #tpu.pipeline_mode<synchronous>, transform_indices = @transform_2, window_bounds = array<i64: 2, 16>}, {pipeline_mode = #tpu.pipeline_mode<synchronous>, transform_indices = @transform_3, window_bounds = array<i64: 14, 256>}, {transform_indices = @transform_4, window_bounds = array<i64: 98>}, {transform_indices = @transform_5, window_bounds = array<i64: 1, 16, 256>}]} {
    %c0 = arith.constant 0 : index
    %c0_0 = arith.constant 0 : index
    %c0_1 = arith.constant 0 : index
    %0 = vector.load %arg1[%c0, %c0_0, %c0_1] : memref<1x16x256xf32, #tpu.memory_space<vmem>>, vector<1x16x256xf32>
    %cst = arith.constant dense<0.000000e+00> : vector<1x16xf32>
    %1 = vector.multi_reduction <add>, %0, %cst [2] : vector<1x16x256xf32> to vector<1x16xf32>
    %cst_2 = arith.constant 2.560000e+02 : f32
    %2 = vector.broadcast %cst_2 : f32 to vector<1x16xf32>
    %3 = arith.divf %1, %2 : vector<1x16xf32>
    %cst_3 = arith.constant dense<0xFF800000> : vector<1x16xf32>
    %4 = vector.multi_reduction <maximumf>, %0, %cst_3 [2] : vector<1x16x256xf32> to vector<1x16xf32>
    %5 = tpu.concatenate %3, %4 in 0 : vector<1x16xf32>, vector<1x16xf32> -> vector<2x16xf32>
    %c0_4 = arith.constant 0 : index
    %c0_5 = arith.constant 0 : index
    %6 = vector.load %arg2[%c0_4, %c0_5] : memref<16x2xf32, #tpu.memory_space<vmem>>, vector<16x2xf32>
    %cst_6 = arith.constant dense<0.000000e+00> : vector<2x2xf32>
    %7 = tpu.matmul %5, %6, %cst_6 {dimension_numbers = #tpu.dot_dimension_numbers<[1], [0], [0], [1], [0, 0, 1, 1], [], []>} : vector<2x16xf32>, vector<16x2xf32>, vector<2x2xf32> -> vector<2x2xf32>
    %cst_7 = arith.constant 0.000000e+00 : f32
    %8 = vector.broadcast %cst_7 : f32 to vector<2x2xf32>
    %9 = arith.maximumf %7, %8 : vector<2x2xf32>
    %c0_8 = arith.constant 0 : index
    %c0_9 = arith.constant 0 : index
    %10 = vector.load %arg3[%c0_8, %c0_9] : memref<2x16xf32, #tpu.memory_space<vmem>>, vector<2x16xf32>
    %cst_10 = arith.constant dense<0.000000e+00> : vector<2x16xf32>
    %11 = tpu.matmul %9, %10, %cst_10 {dimension_numbers = #tpu.dot_dimension_numbers<[1], [0], [0], [1], [0, 0, 1, 1], [], []>} : vector<2x2xf32>, vector<2x16xf32>, vector<2x16xf32> -> vector<2x16xf32>
    %12 = vector.extract_strided_slice %11 {offsets = [0, 0], sizes = [1, 16], strides = [1, 1]} : vector<2x16xf32> to vector<1x16xf32>
    %13 = vector.extract_strided_slice %11 {offsets = [1, 0], sizes = [1, 16], strides = [1, 1]} : vector<2x16xf32> to vector<1x16xf32>
    %14 = arith.addf %12, %13 : vector<1x16xf32>
    %15 = arith.negf %14 : vector<1x16xf32>
    %16 = math.exp %15 : vector<1x16xf32>
    %cst_11 = arith.constant 1.000000e+00 : f32
    %17 = vector.broadcast %cst_11 : f32 to vector<1x16xf32>
    %18 = arith.addf %17, %16 : vector<1x16xf32>
    %19 = arith.divf %17, %18 : vector<1x16xf32>
    %20 = vector.shape_cast %19 : vector<1x16xf32> to vector<1x16x1xf32>
    %21 = vector.broadcast %20 : vector<1x16x1xf32> to vector<1x16x256xf32>
    %22 = arith.mulf %0, %21 : vector<1x16x256xf32>
    %c0_12 = arith.constant 0 : index
    %c0_13 = arith.constant 0 : index
    %c0_14 = arith.constant 0 : index
    %23 = vector.load %arg6[%c0_12, %c0_13, %c0_14] : memref<1x16x256xf32, #tpu.memory_space<vmem>>, vector<1x16x256xf32>
    tpu.vector_store %arg6[%c0_12, %c0_13, %c0_14], %22 {strides = array<i32>} : memref<1x16x256xf32, #tpu.memory_space<vmem>>, vector<1x16x256xf32>,
    %c0_15 = arith.constant 0 : index
    %c0_16 = arith.constant 0 : index
    %c0_17 = arith.constant 0 : index
    %24 = vector.load %arg6[%c0_15, %c0_16, %c0_17] : memref<1x16x256xf32, #tpu.memory_space<vmem>>, vector<1x16x256xf32>
    %cst_18 = arith.constant dense<0.000000e+00> : vector<1x256xf32>
    %25 = vector.multi_reduction <add>, %24, %cst_18 [1] : vector<1x16x256xf32> to vector<1x256xf32>
    %cst_19 = arith.constant 1.600000e+01 : f32
    %26 = vector.broadcast %cst_19 : f32 to vector<1x256xf32>
    %27 = arith.divf %25, %26 : vector<1x256xf32>
    %cst_20 = arith.constant dense<0xFF800000> : vector<1x256xf32>
    %28 = vector.multi_reduction <maximumf>, %24, %cst_20 [1] : vector<1x16x256xf32> to vector<1x256xf32>
    %c0_21 = arith.constant 0 : index
    %29 = memref.load %arg5[%c0_21] : memref<98xf32, #tpu.memory_space<smem>>
    %c1 = arith.constant 1 : index
    %30 = memref.load %arg5[%c1] : memref<98xf32, #tpu.memory_space<smem>>
    %c2 = arith.constant 2 : index
    %31 = memref.load %arg5[%c2] : memref<98xf32, #tpu.memory_space<smem>>
    %c3 = arith.constant 3 : index
    %32 = memref.load %arg5[%c3] : memref<98xf32, #tpu.memory_space<smem>>
    %c4 = arith.constant 4 : index
    %33 = memref.load %arg5[%c4] : memref<98xf32, #tpu.memory_space<smem>>
    %c5 = arith.constant 5 : index
    %34 = memref.load %arg5[%c5] : memref<98xf32, #tpu.memory_space<smem>>
    %c6 = arith.constant 6 : index
    %35 = memref.load %arg5[%c6] : memref<98xf32, #tpu.memory_space<smem>>
    %c7 = arith.constant 7 : index
    %36 = memref.load %arg5[%c7] : memref<98xf32, #tpu.memory_space<smem>>
    %c8 = arith.constant 8 : index
    %37 = memref.load %arg5[%c8] : memref<98xf32, #tpu.memory_space<smem>>
    %c9 = arith.constant 9 : index
    %38 = memref.load %arg5[%c9] : memref<98xf32, #tpu.memory_space<smem>>
    %c10 = arith.constant 10 : index
    %39 = memref.load %arg5[%c10] : memref<98xf32, #tpu.memory_space<smem>>
    %c11 = arith.constant 11 : index
    %40 = memref.load %arg5[%c11] : memref<98xf32, #tpu.memory_space<smem>>
    %c12 = arith.constant 12 : index
    %41 = memref.load %arg5[%c12] : memref<98xf32, #tpu.memory_space<smem>>
    %c13 = arith.constant 13 : index
    %42 = memref.load %arg5[%c13] : memref<98xf32, #tpu.memory_space<smem>>
    %c14 = arith.constant 14 : index
    %43 = memref.load %arg5[%c14] : memref<98xf32, #tpu.memory_space<smem>>
    %c15 = arith.constant 15 : index
    %44 = memref.load %arg5[%c15] : memref<98xf32, #tpu.memory_space<smem>>
    %c16 = arith.constant 16 : index
    %45 = memref.load %arg5[%c16] : memref<98xf32, #tpu.memory_space<smem>>
    %c17 = arith.constant 17 : index
    %46 = memref.load %arg5[%c17] : memref<98xf32, #tpu.memory_space<smem>>
    %c18 = arith.constant 18 : index
    %47 = memref.load %arg5[%c18] : memref<98xf32, #tpu.memory_space<smem>>
    %c19 = arith.constant 19 : index
    %48 = memref.load %arg5[%c19] : memref<98xf32, #tpu.memory_space<smem>>
    %c20 = arith.constant 20 : index
    %49 = memref.load %arg5[%c20] : memref<98xf32, #tpu.memory_space<smem>>
    %c21 = arith.constant 21 : index
    %50 = memref.load %arg5[%c21] : memref<98xf32, #tpu.memory_space<smem>>
    %c22 = arith.constant 22 : index
    %51 = memref.load %arg5[%c22] : memref<98xf32, #tpu.memory_space<smem>>
    %c23 = arith.constant 23 : index
    %52 = memref.load %arg5[%c23] : memref<98xf32, #tpu.memory_space<smem>>
    %c24 = arith.constant 24 : index
    %53 = memref.load %arg5[%c24] : memref<98xf32, #tpu.memory_space<smem>>
    %c25 = arith.constant 25 : index
    %54 = memref.load %arg5[%c25] : memref<98xf32, #tpu.memory_space<smem>>
    %c26 = arith.constant 26 : index
    %55 = memref.load %arg5[%c26] : memref<98xf32, #tpu.memory_space<smem>>
    %c27 = arith.constant 27 : index
    %56 = memref.load %arg5[%c27] : memref<98xf32, #tpu.memory_space<smem>>
    %c28 = arith.constant 28 : index
    %57 = memref.load %arg5[%c28] : memref<98xf32, #tpu.memory_space<smem>>
    %c29 = arith.constant 29 : index
    %58 = memref.load %arg5[%c29] : memref<98xf32, #tpu.memory_space<smem>>
    %c30 = arith.constant 30 : index
    %59 = memref.load %arg5[%c30] : memref<98xf32, #tpu.memory_space<smem>>
    %c31 = arith.constant 31 : index
    %60 = memref.load %arg5[%c31] : memref<98xf32, #tpu.memory_space<smem>>
    %c32 = arith.constant 32 : index
    %61 = memref.load %arg5[%c32] : memref<98xf32, #tpu.memory_space<smem>>
    %c33 = arith.constant 33 : index
    %62 = memref.load %arg5[%c33] : memref<98xf32, #tpu.memory_space<smem>>
    %c34 = arith.constant 34 : index
    %63 = memref.load %arg5[%c34] : memref<98xf32, #tpu.memory_space<smem>>
    %c35 = arith.constant 35 : index
    %64 = memref.load %arg5[%c35] : memref<98xf32, #tpu.memory_space<smem>>
    %c36 = arith.constant 36 : index
    %65 = memref.load %arg5[%c36] : memref<98xf32, #tpu.memory_space<smem>>
    %c37 = arith.constant 37 : index
    %66 = memref.load %arg5[%c37] : memref<98xf32, #tpu.memory_space<smem>>
    %c38 = arith.constant 38 : index
    %67 = memref.load %arg5[%c38] : memref<98xf32, #tpu.memory_space<smem>>
    %c39 = arith.constant 39 : index
    %68 = memref.load %arg5[%c39] : memref<98xf32, #tpu.memory_space<smem>>
    %c40 = arith.constant 40 : index
    %69 = memref.load %arg5[%c40] : memref<98xf32, #tpu.memory_space<smem>>
    %c41 = arith.constant 41 : index
    %70 = memref.load %arg5[%c41] : memref<98xf32, #tpu.memory_space<smem>>
    %c42 = arith.constant 42 : index
    %71 = memref.load %arg5[%c42] : memref<98xf32, #tpu.memory_space<smem>>
    %c43 = arith.constant 43 : index
    %72 = memref.load %arg5[%c43] : memref<98xf32, #tpu.memory_space<smem>>
    %c44 = arith.constant 44 : index
    %73 = memref.load %arg5[%c44] : memref<98xf32, #tpu.memory_space<smem>>
    %c45 = arith.constant 45 : index
    %74 = memref.load %arg5[%c45] : memref<98xf32, #tpu.memory_space<smem>>
    %c46 = arith.constant 46 : index
    %75 = memref.load %arg5[%c46] : memref<98xf32, #tpu.memory_space<smem>>
    %c47 = arith.constant 47 : index
    %76 = memref.load %arg5[%c47] : memref<98xf32, #tpu.memory_space<smem>>
    %c48 = arith.constant 48 : index
    %77 = memref.load %arg5[%c48] : memref<98xf32, #tpu.memory_space<smem>>
    %c49 = arith.constant 49 : index
    %78 = memref.load %arg5[%c49] : memref<98xf32, #tpu.memory_space<smem>>
    %c50 = arith.constant 50 : index
    %79 = memref.load %arg5[%c50] : memref<98xf32, #tpu.memory_space<smem>>
    %c51 = arith.constant 51 : index
    %80 = memref.load %arg5[%c51] : memref<98xf32, #tpu.memory_space<smem>>
    %c52 = arith.constant 52 : index
    %81 = memref.load %arg5[%c52] : memref<98xf32, #tpu.memory_space<smem>>
    %c53 = arith.constant 53 : index
    %82 = memref.load %arg5[%c53] : memref<98xf32, #tpu.memory_space<smem>>
    %c54 = arith.constant 54 : index
    %83 = memref.load %arg5[%c54] : memref<98xf32, #tpu.memory_space<smem>>
    %c55 = arith.constant 55 : index
    %84 = memref.load %arg5[%c55] : memref<98xf32, #tpu.memory_space<smem>>
    %c56 = arith.constant 56 : index
    %85 = memref.load %arg5[%c56] : memref<98xf32, #tpu.memory_space<smem>>
    %c57 = arith.constant 57 : index
    %86 = memref.load %arg5[%c57] : memref<98xf32, #tpu.memory_space<smem>>
    %c58 = arith.constant 58 : index
    %87 = memref.load %arg5[%c58] : memref<98xf32, #tpu.memory_space<smem>>
    %c59 = arith.constant 59 : index
    %88 = memref.load %arg5[%c59] : memref<98xf32, #tpu.memory_space<smem>>
    %c60 = arith.constant 60 : index
    %89 = memref.load %arg5[%c60] : memref<98xf32, #tpu.memory_space<smem>>
    %c61 = arith.constant 61 : index
    %90 = memref.load %arg5[%c61] : memref<98xf32, #tpu.memory_space<smem>>
    %c62 = arith.constant 62 : index
    %91 = memref.load %arg5[%c62] : memref<98xf32, #tpu.memory_space<smem>>
    %c63 = arith.constant 63 : index
    %92 = memref.load %arg5[%c63] : memref<98xf32, #tpu.memory_space<smem>>
    %c64 = arith.constant 64 : index
    %93 = memref.load %arg5[%c64] : memref<98xf32, #tpu.memory_space<smem>>
    %c65 = arith.constant 65 : index
    %94 = memref.load %arg5[%c65] : memref<98xf32, #tpu.memory_space<smem>>
    %c66 = arith.constant 66 : index
    %95 = memref.load %arg5[%c66] : memref<98xf32, #tpu.memory_space<smem>>
    %c67 = arith.constant 67 : index
    %96 = memref.load %arg5[%c67] : memref<98xf32, #tpu.memory_space<smem>>
    %c68 = arith.constant 68 : index
    %97 = memref.load %arg5[%c68] : memref<98xf32, #tpu.memory_space<smem>>
    %c69 = arith.constant 69 : index
    %98 = memref.load %arg5[%c69] : memref<98xf32, #tpu.memory_space<smem>>
    %c70 = arith.constant 70 : index
    %99 = memref.load %arg5[%c70] : memref<98xf32, #tpu.memory_space<smem>>
    %c71 = arith.constant 71 : index
    %100 = memref.load %arg5[%c71] : memref<98xf32, #tpu.memory_space<smem>>
    %c72 = arith.constant 72 : index
    %101 = memref.load %arg5[%c72] : memref<98xf32, #tpu.memory_space<smem>>
    %c73 = arith.constant 73 : index
    %102 = memref.load %arg5[%c73] : memref<98xf32, #tpu.memory_space<smem>>
    %c74 = arith.constant 74 : index
    %103 = memref.load %arg5[%c74] : memref<98xf32, #tpu.memory_space<smem>>
    %c75 = arith.constant 75 : index
    %104 = memref.load %arg5[%c75] : memref<98xf32, #tpu.memory_space<smem>>
    %c76 = arith.constant 76 : index
    %105 = memref.load %arg5[%c76] : memref<98xf32, #tpu.memory_space<smem>>
    %c77 = arith.constant 77 : index
    %106 = memref.load %arg5[%c77] : memref<98xf32, #tpu.memory_space<smem>>
    %c78 = arith.constant 78 : index
    %107 = memref.load %arg5[%c78] : memref<98xf32, #tpu.memory_space<smem>>
    %c79 = arith.constant 79 : index
    %108 = memref.load %arg5[%c79] : memref<98xf32, #tpu.memory_space<smem>>
    %c80 = arith.constant 80 : index
    %109 = memref.load %arg5[%c80] : memref<98xf32, #tpu.memory_space<smem>>
    %c81 = arith.constant 81 : index
    %110 = memref.load %arg5[%c81] : memref<98xf32, #tpu.memory_space<smem>>
    %c82 = arith.constant 82 : index
    %111 = memref.load %arg5[%c82] : memref<98xf32, #tpu.memory_space<smem>>
    %c83 = arith.constant 83 : index
    %112 = memref.load %arg5[%c83] : memref<98xf32, #tpu.memory_space<smem>>
    %c84 = arith.constant 84 : index
    %113 = memref.load %arg5[%c84] : memref<98xf32, #tpu.memory_space<smem>>
    %c85 = arith.constant 85 : index
    %114 = memref.load %arg5[%c85] : memref<98xf32, #tpu.memory_space<smem>>
    %c86 = arith.constant 86 : index
    %115 = memref.load %arg5[%c86] : memref<98xf32, #tpu.memory_space<smem>>
    %c87 = arith.constant 87 : index
    %116 = memref.load %arg5[%c87] : memref<98xf32, #tpu.memory_space<smem>>
    %c88 = arith.constant 88 : index
    %117 = memref.load %arg5[%c88] : memref<98xf32, #tpu.memory_space<smem>>
    %c89 = arith.constant 89 : index
    %118 = memref.load %arg5[%c89] : memref<98xf32, #tpu.memory_space<smem>>
    %c90 = arith.constant 90 : index
    %119 = memref.load %arg5[%c90] : memref<98xf32, #tpu.memory_space<smem>>
    %c91 = arith.constant 91 : index
    %120 = memref.load %arg5[%c91] : memref<98xf32, #tpu.memory_space<smem>>
    %c92 = arith.constant 92 : index
    %121 = memref.load %arg5[%c92] : memref<98xf32, #tpu.memory_space<smem>>
    %c93 = arith.constant 93 : index
    %122 = memref.load %arg5[%c93] : memref<98xf32, #tpu.memory_space<smem>>
    %c94 = arith.constant 94 : index
    %123 = memref.load %arg5[%c94] : memref<98xf32, #tpu.memory_space<smem>>
    %c95 = arith.constant 95 : index
    %124 = memref.load %arg5[%c95] : memref<98xf32, #tpu.memory_space<smem>>
    %c96 = arith.constant 96 : index
    %125 = memref.load %arg5[%c96] : memref<98xf32, #tpu.memory_space<smem>>
    %c97 = arith.constant 97 : index
    %126 = memref.load %arg5[%c97] : memref<98xf32, #tpu.memory_space<smem>>
    %cst_22 = arith.constant 0.000000e+00 : f32
    %127 = vector.broadcast %cst_22 : f32 to vector<1x256xf32>
    %cst_23 = arith.constant 0.000000e+00 : f32
    %128 = vector.broadcast %cst_23 : f32 to vector<1x256xf32>
    %cst_24 = arith.constant 0.000000e+00 : f32
    %129 = vector.broadcast %cst_24 : f32 to vector<1x256xf32>
    %cst_25 = arith.constant 0.000000e+00 : f32
    %130 = vector.broadcast %cst_25 : f32 to vector<1x256xf32>
    %cst_26 = arith.constant 0.000000e+00 : f32
    %131 = vector.broadcast %cst_26 : f32 to vector<1x256xf32>
    %cst_27 = arith.constant 0.000000e+00 : f32
    %132 = vector.broadcast %cst_27 : f32 to vector<1x256xf32>
    %cst_28 = arith.constant 0.000000e+00 : f32
    %133 = vector.broadcast %cst_28 : f32 to vector<1x256xf32>
    %c0_29 = arith.constant 0 : index
    %c0_30 = arith.constant 0 : index
    %134 = vector.load %arg4[%c0_29, %c0_30] : memref<14x256xf32, #tpu.memory_space<vmem>>, vector<1x256xf32>
    %135 = vector.shape_cast %134 : vector<1x256xf32> to vector<256xf32>
    %136 = vector.shape_cast %135 : vector<256xf32> to vector<1x256xf32>
    %c48_i32 = arith.constant 48 : i32
    %137 = tpu.dynamic_rotate %27 by %c48_i32 dim 1 : vector<1x256xf32>, i32 -> vector<1x256xf32>
    %138 = arith.mulf %137, %136 : vector<1x256xf32>
    %c48_i32_31 = arith.constant 48 : i32
    %139 = tpu.dynamic_rotate %28 by %c48_i32_31 dim 1 : vector<1x256xf32>, i32 -> vector<1x256xf32>
    %140 = arith.mulf %139, %136 : vector<1x256xf32>
    %141 = vector.broadcast %29 : f32 to vector<1x256xf32>
    %142 = arith.mulf %141, %138 : vector<1x256xf32>
    %143 = arith.addf %127, %142 : vector<1x256xf32>
    %144 = vector.broadcast %78 : f32 to vector<1x256xf32>
    %145 = arith.mulf %144, %140 : vector<1x256xf32>
    %146 = arith.addf %143, %145 : vector<1x256xf32>
    %147 = vector.broadcast %30 : f32 to vector<1x256xf32>
    %148 = arith.mulf %147, %138 : vector<1x256xf32>
    %149 = arith.addf %128, %148 : vector<1x256xf32>
    %150 = vector.broadcast %79 : f32 to vector<1x256xf32>
    %151 = arith.mulf %150, %140 : vector<1x256xf32>
    %152 = arith.addf %149, %151 : vector<1x256xf32>
    %153 = vector.broadcast %31 : f32 to vector<1x256xf32>
    %154 = arith.mulf %153, %138 : vector<1x256xf32>
    %155 = arith.addf %129, %154 : vector<1x256xf32>
    %156 = vector.broadcast %80 : f32 to vector<1x256xf32>
    %157 = arith.mulf %156, %140 : vector<1x256xf32>
    %158 = arith.addf %155, %157 : vector<1x256xf32>
    %159 = vector.broadcast %32 : f32 to vector<1x256xf32>
    %160 = arith.mulf %159, %138 : vector<1x256xf32>
    %161 = arith.addf %130, %160 : vector<1x256xf32>
    %162 = vector.broadcast %81 : f32 to vector<1x256xf32>
    %163 = arith.mulf %162, %140 : vector<1x256xf32>
    %164 = arith.addf %161, %163 : vector<1x256xf32>
    %165 = vector.broadcast %33 : f32 to vector<1x256xf32>
    %166 = arith.mulf %165, %138 : vector<1x256xf32>
    %167 = arith.addf %131, %166 : vector<1x256xf32>
    %168 = vector.broadcast %82 : f32 to vector<1x256xf32>
    %169 = arith.mulf %168, %140 : vector<1x256xf32>
    %170 = arith.addf %167, %169 : vector<1x256xf32>
    %171 = vector.broadcast %34 : f32 to vector<1x256xf32>
    %172 = arith.mulf %171, %138 : vector<1x256xf32>
    %173 = arith.addf %132, %172 : vector<1x256xf32>
    %174 = vector.broadcast %83 : f32 to vector<1x256xf32>
    %175 = arith.mulf %174, %140 : vector<1x256xf32>
    %176 = arith.addf %173, %175 : vector<1x256xf32>
    %177 = vector.broadcast %35 : f32 to vector<1x256xf32>
    %178 = arith.mulf %177, %138 : vector<1x256xf32>
    %179 = arith.addf %133, %178 : vector<1x256xf32>
    %180 = vector.broadcast %84 : f32 to vector<1x256xf32>
    %181 = arith.mulf %180, %140 : vector<1x256xf32>
    %182 = arith.addf %179, %181 : vector<1x256xf32>
    %c1_32 = arith.constant 1 : index
    %c0_33 = arith.constant 0 : index
    %183 = vector.load %arg4[%c1_32, %c0_33] : memref<14x256xf32, #tpu.memory_space<vmem>>, vector<1x256xf32>
    %184 = vector.shape_cast %183 : vector<1x256xf32> to vector<256xf32>
    %185 = vector.shape_cast %184 : vector<256xf32> to vector<1x256xf32>
    %c32_i32 = arith.constant 32 : i32
    %186 = tpu.dynamic_rotate %27 by %c32_i32 dim 1 : vector<1x256xf32>, i32 -> vector<1x256xf32>
    %187 = arith.mulf %186, %185 : vector<1x256xf32>
    %c32_i32_34 = arith.constant 32 : i32
    %188 = tpu.dynamic_rotate %28 by %c32_i32_34 dim 1 : vector<1x256xf32>, i32 -> vector<1x256xf32>
    %189 = arith.mulf %188, %185 : vector<1x256xf32>
    %190 = vector.broadcast %36 : f32 to vector<1x256xf32>
    %191 = arith.mulf %190, %187 : vector<1x256xf32>
    %192 = arith.addf %146, %191 : vector<1x256xf32>
    %193 = vector.broadcast %85 : f32 to vector<1x256xf32>
    %194 = arith.mulf %193, %189 : vector<1x256xf32>
    %195 = arith.addf %192, %194 : vector<1x256xf32>
    %196 = vector.broadcast %37 : f32 to vector<1x256xf32>
    %197 = arith.mulf %196, %187 : vector<1x256xf32>
    %198 = arith.addf %152, %197 : vector<1x256xf32>
    %199 = vector.broadcast %86 : f32 to vector<1x256xf32>
    %200 = arith.mulf %199, %189 : vector<1x256xf32>
    %201 = arith.addf %198, %200 : vector<1x256xf32>
    %202 = vector.broadcast %38 : f32 to vector<1x256xf32>
    %203 = arith.mulf %202, %187 : vector<1x256xf32>
    %204 = arith.addf %158, %203 : vector<1x256xf32>
    %205 = vector.broadcast %87 : f32 to vector<1x256xf32>
    %206 = arith.mulf %205, %189 : vector<1x256xf32>
    %207 = arith.addf %204, %206 : vector<1x256xf32>
    %208 = vector.broadcast %39 : f32 to vector<1x256xf32>
    %209 = arith.mulf %208, %187 : vector<1x256xf32>
    %210 = arith.addf %164, %209 : vector<1x256xf32>
    %211 = vector.broadcast %88 : f32 to vector<1x256xf32>
    %212 = arith.mulf %211, %189 : vector<1x256xf32>
    %213 = arith.addf %210, %212 : vector<1x256xf32>
    %214 = vector.broadcast %40 : f32 to vector<1x256xf32>
    %215 = arith.mulf %214, %187 : vector<1x256xf32>
    %216 = arith.addf %170, %215 : vector<1x256xf32>
    %217 = vector.broadcast %89 : f32 to vector<1x256xf32>
    %218 = arith.mulf %217, %189 : vector<1x256xf32>
    %219 = arith.addf %216, %218 : vector<1x256xf32>
    %220 = vector.broadcast %41 : f32 to vector<1x256xf32>
    %221 = arith.mulf %220, %187 : vector<1x256xf32>
    %222 = arith.addf %176, %221 : vector<1x256xf32>
    %223 = vector.broadcast %90 : f32 to vector<1x256xf32>
    %224 = arith.mulf %223, %189 : vector<1x256xf32>
    %225 = arith.addf %222, %224 : vector<1x256xf32>
    %226 = vector.broadcast %42 : f32 to vector<1x256xf32>
    %227 = arith.mulf %226, %187 : vector<1x256xf32>
    %228 = arith.addf %182, %227 : vector<1x256xf32>
    %229 = vector.broadcast %91 : f32 to vector<1x256xf32>
    %230 = arith.mulf %229, %189 : vector<1x256xf32>
    %231 = arith.addf %228, %230 : vector<1x256xf32>
    %c2_35 = arith.constant 2 : index
    %c0_36 = arith.constant 0 : index
    %232 = vector.load %arg4[%c2_35, %c0_36] : memref<14x256xf32, #tpu.memory_space<vmem>>, vector<1x256xf32>
    %233 = vector.shape_cast %232 : vector<1x256xf32> to vector<256xf32>
    %234 = vector.shape_cast %233 : vector<256xf32> to vector<1x256xf32>
    %c16_i32 = arith.constant 16 : i32
    %235 = tpu.dynamic_rotate %27 by %c16_i32 dim 1 : vector<1x256xf32>, i32 -> vector<1x256xf32>
    %236 = arith.mulf %235, %234 : vector<1x256xf32>
    %c16_i32_37 = arith.constant 16 : i32
    %237 = tpu.dynamic_rotate %28 by %c16_i32_37 dim 1 : vector<1x256xf32>, i32 -> vector<1x256xf32>
    %238 = arith.mulf %237, %234 : vector<1x256xf32>
    %239 = vector.broadcast %43 : f32 to vector<1x256xf32>
    %240 = arith.mulf %239, %236 : vector<1x256xf32>
    %241 = arith.addf %195, %240 : vector<1x256xf32>
    %242 = vector.broadcast %92 : f32 to vector<1x256xf32>
    %243 = arith.mulf %242, %238 : vector<1x256xf32>
    %244 = arith.addf %241, %243 : vector<1x256xf32>
    %245 = vector.broadcast %44 : f32 to vector<1x256xf32>
    %246 = arith.mulf %245, %236 : vector<1x256xf32>
    %247 = arith.addf %201, %246 : vector<1x256xf32>
    %248 = vector.broadcast %93 : f32 to vector<1x256xf32>
    %249 = arith.mulf %248, %238 : vector<1x256xf32>
    %250 = arith.addf %247, %249 : vector<1x256xf32>
    %251 = vector.broadcast %45 : f32 to vector<1x256xf32>
    %252 = arith.mulf %251, %236 : vector<1x256xf32>
    %253 = arith.addf %207, %252 : vector<1x256xf32>
    %254 = vector.broadcast %94 : f32 to vector<1x256xf32>
    %255 = arith.mulf %254, %238 : vector<1x256xf32>
    %256 = arith.addf %253, %255 : vector<1x256xf32>
    %257 = vector.broadcast %46 : f32 to vector<1x256xf32>
    %258 = arith.mulf %257, %236 : vector<1x256xf32>
    %259 = arith.addf %213, %258 : vector<1x256xf32>
    %260 = vector.broadcast %95 : f32 to vector<1x256xf32>
    %261 = arith.mulf %260, %238 : vector<1x256xf32>
    %262 = arith.addf %259, %261 : vector<1x256xf32>
    %263 = vector.broadcast %47 : f32 to vector<1x256xf32>
    %264 = arith.mulf %263, %236 : vector<1x256xf32>
    %265 = arith.addf %219, %264 : vector<1x256xf32>
    %266 = vector.broadcast %96 : f32 to vector<1x256xf32>
    %267 = arith.mulf %266, %238 : vector<1x256xf32>
    %268 = arith.addf %265, %267 : vector<1x256xf32>
    %269 = vector.broadcast %48 : f32 to vector<1x256xf32>
    %270 = arith.mulf %269, %236 : vector<1x256xf32>
    %271 = arith.addf %225, %270 : vector<1x256xf32>
    %272 = vector.broadcast %97 : f32 to vector<1x256xf32>
    %273 = arith.mulf %272, %238 : vector<1x256xf32>
    %274 = arith.addf %271, %273 : vector<1x256xf32>
    %275 = vector.broadcast %49 : f32 to vector<1x256xf32>
    %276 = arith.mulf %275, %236 : vector<1x256xf32>
    %277 = arith.addf %231, %276 : vector<1x256xf32>
    %278 = vector.broadcast %98 : f32 to vector<1x256xf32>
    %279 = arith.mulf %278, %238 : vector<1x256xf32>
    %280 = arith.addf %277, %279 : vector<1x256xf32>
    %281 = vector.broadcast %50 : f32 to vector<1x256xf32>
    %282 = arith.mulf %281, %27 : vector<1x256xf32>
    %283 = arith.addf %244, %282 : vector<1x256xf32>
    %284 = vector.broadcast %99 : f32 to vector<1x256xf32>
    %285 = arith.mulf %284, %28 : vector<1x256xf32>
    %286 = arith.addf %283, %285 : vector<1x256xf32>
    %287 = vector.broadcast %51 : f32 to vector<1x256xf32>
    %288 = arith.mulf %287, %27 : vector<1x256xf32>
    %289 = arith.addf %250, %288 : vector<1x256xf32>
    %290 = vector.broadcast %100 : f32 to vector<1x256xf32>
    %291 = arith.mulf %290, %28 : vector<1x256xf32>
    %292 = arith.addf %289, %291 : vector<1x256xf32>
    %293 = vector.broadcast %52 : f32 to vector<1x256xf32>
    %294 = arith.mulf %293, %27 : vector<1x256xf32>
    %295 = arith.addf %256, %294 : vector<1x256xf32>
    %296 = vector.broadcast %101 : f32 to vector<1x256xf32>
    %297 = arith.mulf %296, %28 : vector<1x256xf32>
    %298 = arith.addf %295, %297 : vector<1x256xf32>
    %299 = vector.broadcast %53 : f32 to vector<1x256xf32>
    %300 = arith.mulf %299, %27 : vector<1x256xf32>
    %301 = arith.addf %262, %300 : vector<1x256xf32>
    %302 = vector.broadcast %102 : f32 to vector<1x256xf32>
    %303 = arith.mulf %302, %28 : vector<1x256xf32>
    %304 = arith.addf %301, %303 : vector<1x256xf32>
    %305 = vector.broadcast %54 : f32 to vector<1x256xf32>
    %306 = arith.mulf %305, %27 : vector<1x256xf32>
    %307 = arith.addf %268, %306 : vector<1x256xf32>
    %308 = vector.broadcast %103 : f32 to vector<1x256xf32>
    %309 = arith.mulf %308, %28 : vector<1x256xf32>
    %310 = arith.addf %307, %309 : vector<1x256xf32>
    %311 = vector.broadcast %55 : f32 to vector<1x256xf32>
    %312 = arith.mulf %311, %27 : vector<1x256xf32>
    %313 = arith.addf %274, %312 : vector<1x256xf32>
    %314 = vector.broadcast %104 : f32 to vector<1x256xf32>
    %315 = arith.mulf %314, %28 : vector<1x256xf32>
    %316 = arith.addf %313, %315 : vector<1x256xf32>
    %317 = vector.broadcast %56 : f32 to vector<1x256xf32>
    %318 = arith.mulf %317, %27 : vector<1x256xf32>
    %319 = arith.addf %280, %318 : vector<1x256xf32>
    %320 = vector.broadcast %105 : f32 to vector<1x256xf32>
    %321 = arith.mulf %320, %28 : vector<1x256xf32>
    %322 = arith.addf %319, %321 : vector<1x256xf32>
    %c4_38 = arith.constant 4 : index
    %c0_39 = arith.constant 0 : index
    %323 = vector.load %arg4[%c4_38, %c0_39] : memref<14x256xf32, #tpu.memory_space<vmem>>, vector<1x256xf32>
    %324 = vector.shape_cast %323 : vector<1x256xf32> to vector<256xf32>
    %325 = vector.shape_cast %324 : vector<256xf32> to vector<1x256xf32>
    %c240_i32 = arith.constant 240 : i32
    %326 = tpu.dynamic_rotate %27 by %c240_i32 dim 1 : vector<1x256xf32>, i32 -> vector<1x256xf32>
    %327 = arith.mulf %326, %325 : vector<1x256xf32>
    %c240_i32_40 = arith.constant 240 : i32
    %328 = tpu.dynamic_rotate %28 by %c240_i32_40 dim 1 : vector<1x256xf32>, i32 -> vector<1x256xf32>
    %329 = arith.mulf %328, %325 : vector<1x256xf32>
    %330 = vector.broadcast %57 : f32 to vector<1x256xf32>
    %331 = arith.mulf %330, %327 : vector<1x256xf32>
    %332 = arith.addf %286, %331 : vector<1x256xf32>
    %333 = vector.broadcast %106 : f32 to vector<1x256xf32>
    %334 = arith.mulf %333, %329 : vector<1x256xf32>
    %335 = arith.addf %332, %334 : vector<1x256xf32>
    %336 = vector.broadcast %58 : f32 to vector<1x256xf32>
    %337 = arith.mulf %336, %327 : vector<1x256xf32>
    %338 = arith.addf %292, %337 : vector<1x256xf32>
    %339 = vector.broadcast %107 : f32 to vector<1x256xf32>
    %340 = arith.mulf %339, %329 : vector<1x256xf32>
    %341 = arith.addf %338, %340 : vector<1x256xf32>
    %342 = vector.broadcast %59 : f32 to vector<1x256xf32>
    %343 = arith.mulf %342, %327 : vector<1x256xf32>
    %344 = arith.addf %298, %343 : vector<1x256xf32>
    %345 = vector.broadcast %108 : f32 to vector<1x256xf32>
    %346 = arith.mulf %345, %329 : vector<1x256xf32>
    %347 = arith.addf %344, %346 : vector<1x256xf32>
    %348 = vector.broadcast %60 : f32 to vector<1x256xf32>
    %349 = arith.mulf %348, %327 : vector<1x256xf32>
    %350 = arith.addf %304, %349 : vector<1x256xf32>
    %351 = vector.broadcast %109 : f32 to vector<1x256xf32>
    %352 = arith.mulf %351, %329 : vector<1x256xf32>
    %353 = arith.addf %350, %352 : vector<1x256xf32>
    %354 = vector.broadcast %61 : f32 to vector<1x256xf32>
    %355 = arith.mulf %354, %327 : vector<1x256xf32>
    %356 = arith.addf %310, %355 : vector<1x256xf32>
    %357 = vector.broadcast %110 : f32 to vector<1x256xf32>
    %358 = arith.mulf %357, %329 : vector<1x256xf32>
    %359 = arith.addf %356, %358 : vector<1x256xf32>
    %360 = vector.broadcast %62 : f32 to vector<1x256xf32>
    %361 = arith.mulf %360, %327 : vector<1x256xf32>
    %362 = arith.addf %316, %361 : vector<1x256xf32>
    %363 = vector.broadcast %111 : f32 to vector<1x256xf32>
    %364 = arith.mulf %363, %329 : vector<1x256xf32>
    %365 = arith.addf %362, %364 : vector<1x256xf32>
    %366 = vector.broadcast %63 : f32 to vector<1x256xf32>
    %367 = arith.mulf %366, %327 : vector<1x256xf32>
    %368 = arith.addf %322, %367 : vector<1x256xf32>
    %369 = vector.broadcast %112 : f32 to vector<1x256xf32>
    %370 = arith.mulf %369, %329 : vector<1x256xf32>
    %371 = arith.addf %368, %370 : vector<1x256xf32>
    %c5_41 = arith.constant 5 : index
    %c0_42 = arith.constant 0 : index
    %372 = vector.load %arg4[%c5_41, %c0_42] : memref<14x256xf32, #tpu.memory_space<vmem>>, vector<1x256xf32>
    %373 = vector.shape_cast %372 : vector<1x256xf32> to vector<256xf32>
    %374 = vector.shape_cast %373 : vector<256xf32> to vector<1x256xf32>
    %c224_i32 = arith.constant 224 : i32
    %375 = tpu.dynamic_rotate %27 by %c224_i32 dim 1 : vector<1x256xf32>, i32 -> vector<1x256xf32>
    %376 = arith.mulf %375, %374 : vector<1x256xf32>
    %c224_i32_43 = arith.constant 224 : i32
    %377 = tpu.dynamic_rotate %28 by %c224_i32_43 dim 1 : vector<1x256xf32>, i32 -> vector<1x256xf32>
    %378 = arith.mulf %377, %374 : vector<1x256xf32>
    %379 = vector.broadcast %64 : f32 to vector<1x256xf32>
    %380 = arith.mulf %379, %376 : vector<1x256xf32>
    %381 = arith.addf %335, %380 : vector<1x256xf32>
    %382 = vector.broadcast %113 : f32 to vector<1x256xf32>
    %383 = arith.mulf %382, %378 : vector<1x256xf32>
    %384 = arith.addf %381, %383 : vector<1x256xf32>
    %385 = vector.broadcast %65 : f32 to vector<1x256xf32>
    %386 = arith.mulf %385, %376 : vector<1x256xf32>
    %387 = arith.addf %341, %386 : vector<1x256xf32>
    %388 = vector.broadcast %114 : f32 to vector<1x256xf32>
    %389 = arith.mulf %388, %378 : vector<1x256xf32>
    %390 = arith.addf %387, %389 : vector<1x256xf32>
    %391 = vector.broadcast %66 : f32 to vector<1x256xf32>
    %392 = arith.mulf %391, %376 : vector<1x256xf32>
    %393 = arith.addf %347, %392 : vector<1x256xf32>
    %394 = vector.broadcast %115 : f32 to vector<1x256xf32>
    %395 = arith.mulf %394, %378 : vector<1x256xf32>
    %396 = arith.addf %393, %395 : vector<1x256xf32>
    %397 = vector.broadcast %67 : f32 to vector<1x256xf32>
    %398 = arith.mulf %397, %376 : vector<1x256xf32>
    %399 = arith.addf %353, %398 : vector<1x256xf32>
    %400 = vector.broadcast %116 : f32 to vector<1x256xf32>
    %401 = arith.mulf %400, %378 : vector<1x256xf32>
    %402 = arith.addf %399, %401 : vector<1x256xf32>
    %403 = vector.broadcast %68 : f32 to vector<1x256xf32>
    %404 = arith.mulf %403, %376 : vector<1x256xf32>
    %405 = arith.addf %359, %404 : vector<1x256xf32>
    %406 = vector.broadcast %117 : f32 to vector<1x256xf32>
    %407 = arith.mulf %406, %378 : vector<1x256xf32>
    %408 = arith.addf %405, %407 : vector<1x256xf32>
    %409 = vector.broadcast %69 : f32 to vector<1x256xf32>
    %410 = arith.mulf %409, %376 : vector<1x256xf32>
    %411 = arith.addf %365, %410 : vector<1x256xf32>
    %412 = vector.broadcast %118 : f32 to vector<1x256xf32>
    %413 = arith.mulf %412, %378 : vector<1x256xf32>
    %414 = arith.addf %411, %413 : vector<1x256xf32>
    %415 = vector.broadcast %70 : f32 to vector<1x256xf32>
    %416 = arith.mulf %415, %376 : vector<1x256xf32>
    %417 = arith.addf %371, %416 : vector<1x256xf32>
    %418 = vector.broadcast %119 : f32 to vector<1x256xf32>
    %419 = arith.mulf %418, %378 : vector<1x256xf32>
    %420 = arith.addf %417, %419 : vector<1x256xf32>
    %c6_44 = arith.constant 6 : index
    %c0_45 = arith.constant 0 : index
    %421 = vector.load %arg4[%c6_44, %c0_45] : memref<14x256xf32, #tpu.memory_space<vmem>>, vector<1x256xf32>
    %422 = vector.shape_cast %421 : vector<1x256xf32> to vector<256xf32>
    %423 = vector.shape_cast %422 : vector<256xf32> to vector<1x256xf32>
    %c208_i32 = arith.constant 208 : i32
    %424 = tpu.dynamic_rotate %27 by %c208_i32 dim 1 : vector<1x256xf32>, i32 -> vector<1x256xf32>
    %425 = arith.mulf %424, %423 : vector<1x256xf32>
    %c208_i32_46 = arith.constant 208 : i32
    %426 = tpu.dynamic_rotate %28 by %c208_i32_46 dim 1 : vector<1x256xf32>, i32 -> vector<1x256xf32>
    %427 = arith.mulf %426, %423 : vector<1x256xf32>
    %428 = vector.broadcast %71 : f32 to vector<1x256xf32>
    %429 = arith.mulf %428, %425 : vector<1x256xf32>
    %430 = arith.addf %384, %429 : vector<1x256xf32>
    %431 = vector.broadcast %120 : f32 to vector<1x256xf32>
    %432 = arith.mulf %431, %427 : vector<1x256xf32>
    %433 = arith.addf %430, %432 : vector<1x256xf32>
    %434 = vector.broadcast %72 : f32 to vector<1x256xf32>
    %435 = arith.mulf %434, %425 : vector<1x256xf32>
    %436 = arith.addf %390, %435 : vector<1x256xf32>
    %437 = vector.broadcast %121 : f32 to vector<1x256xf32>
    %438 = arith.mulf %437, %427 : vector<1x256xf32>
    %439 = arith.addf %436, %438 : vector<1x256xf32>
    %440 = vector.broadcast %73 : f32 to vector<1x256xf32>
    %441 = arith.mulf %440, %425 : vector<1x256xf32>
    %442 = arith.addf %396, %441 : vector<1x256xf32>
    %443 = vector.broadcast %122 : f32 to vector<1x256xf32>
    %444 = arith.mulf %443, %427 : vector<1x256xf32>
    %445 = arith.addf %442, %444 : vector<1x256xf32>
    %446 = vector.broadcast %74 : f32 to vector<1x256xf32>
    %447 = arith.mulf %446, %425 : vector<1x256xf32>
    %448 = arith.addf %402, %447 : vector<1x256xf32>
    %449 = vector.broadcast %123 : f32 to vector<1x256xf32>
    %450 = arith.mulf %449, %427 : vector<1x256xf32>
    %451 = arith.addf %448, %450 : vector<1x256xf32>
    %452 = vector.broadcast %75 : f32 to vector<1x256xf32>
    %453 = arith.mulf %452, %425 : vector<1x256xf32>
    %454 = arith.addf %408, %453 : vector<1x256xf32>
    %455 = vector.broadcast %124 : f32 to vector<1x256xf32>
    %456 = arith.mulf %455, %427 : vector<1x256xf32>
    %457 = arith.addf %454, %456 : vector<1x256xf32>
    %458 = vector.broadcast %76 : f32 to vector<1x256xf32>
    %459 = arith.mulf %458, %425 : vector<1x256xf32>
    %460 = arith.addf %414, %459 : vector<1x256xf32>
    %461 = vector.broadcast %125 : f32 to vector<1x256xf32>
    %462 = arith.mulf %461, %427 : vector<1x256xf32>
    %463 = arith.addf %460, %462 : vector<1x256xf32>
    %464 = vector.broadcast %77 : f32 to vector<1x256xf32>
    %465 = arith.mulf %464, %425 : vector<1x256xf32>
    %466 = arith.addf %420, %465 : vector<1x256xf32>
    %467 = vector.broadcast %126 : f32 to vector<1x256xf32>
    %468 = arith.mulf %467, %427 : vector<1x256xf32>
    %469 = arith.addf %466, %468 : vector<1x256xf32>
    %c7_47 = arith.constant 7 : index
    %c0_48 = arith.constant 0 : index
    %470 = vector.load %arg4[%c7_47, %c0_48] : memref<14x256xf32, #tpu.memory_space<vmem>>, vector<1x256xf32>
    %471 = vector.shape_cast %470 : vector<1x256xf32> to vector<256xf32>
    %472 = vector.shape_cast %471 : vector<256xf32> to vector<1x256xf32>
    %c3_i32 = arith.constant 3 : i32
    %473 = tpu.dynamic_rotate %433 by %c3_i32 dim 1 : vector<1x256xf32>, i32 -> vector<1x256xf32>
    %474 = arith.mulf %473, %472 : vector<1x256xf32>
    %475 = arith.addf %451, %474 : vector<1x256xf32>
    %c8_49 = arith.constant 8 : index
    %c0_50 = arith.constant 0 : index
    %476 = vector.load %arg4[%c8_49, %c0_50] : memref<14x256xf32, #tpu.memory_space<vmem>>, vector<1x256xf32>
    %477 = vector.shape_cast %476 : vector<1x256xf32> to vector<256xf32>
    %478 = vector.shape_cast %477 : vector<256xf32> to vector<1x256xf32>
    %c2_i32 = arith.constant 2 : i32
    %479 = tpu.dynamic_rotate %439 by %c2_i32 dim 1 : vector<1x256xf32>, i32 -> vector<1x256xf32>
    %480 = arith.mulf %479, %478 : vector<1x256xf32>
    %481 = arith.addf %475, %480 : vector<1x256xf32>
    %c9_51 = arith.constant 9 : index
    %c0_52 = arith.constant 0 : index
    %482 = vector.load %arg4[%c9_51, %c0_52] : memref<14x256xf32, #tpu.memory_space<vmem>>, vector<1x256xf32>
    %483 = vector.shape_cast %482 : vector<1x256xf32> to vector<256xf32>
    %484 = vector.shape_cast %483 : vector<256xf32> to vector<1x256xf32>
    %c1_i32 = arith.constant 1 : i32
    %485 = tpu.dynamic_rotate %445 by %c1_i32 dim 1 : vector<1x256xf32>, i32 -> vector<1x256xf32>
    %486 = arith.mulf %485, %484 : vector<1x256xf32>
    %487 = arith.addf %481, %486 : vector<1x256xf32>
    %c11_53 = arith.constant 11 : index
    %c0_54 = arith.constant 0 : index
    %488 = vector.load %arg4[%c11_53, %c0_54] : memref<14x256xf32, #tpu.memory_space<vmem>>, vector<1x256xf32>
    %489 = vector.shape_cast %488 : vector<1x256xf32> to vector<256xf32>
    %490 = vector.shape_cast %489 : vector<256xf32> to vector<1x256xf32>
    %c255_i32 = arith.constant 255 : i32
    %491 = tpu.dynamic_rotate %457 by %c255_i32 dim 1 : vector<1x256xf32>, i32 -> vector<1x256xf32>
    %492 = arith.mulf %491, %490 : vector<1x256xf32>
    %493 = arith.addf %487, %492 : vector<1x256xf32>
    %c12_55 = arith.constant 12 : index
    %c0_56 = arith.constant 0 : index
    %494 = vector.load %arg4[%c12_55, %c0_56] : memref<14x256xf32, #tpu.memory_space<vmem>>, vector<1x256xf32>
    %495 = vector.shape_cast %494 : vector<1x256xf32> to vector<256xf32>
    %496 = vector.shape_cast %495 : vector<256xf32> to vector<1x256xf32>
    %c254_i32 = arith.constant 254 : i32
    %497 = tpu.dynamic_rotate %463 by %c254_i32 dim 1 : vector<1x256xf32>, i32 -> vector<1x256xf32>
    %498 = arith.mulf %497, %496 : vector<1x256xf32>
    %499 = arith.addf %493, %498 : vector<1x256xf32>
    %c13_57 = arith.constant 13 : index
    %c0_58 = arith.constant 0 : index
    %500 = vector.load %arg4[%c13_57, %c0_58] : memref<14x256xf32, #tpu.memory_space<vmem>>, vector<1x256xf32>
    %501 = vector.shape_cast %500 : vector<1x256xf32> to vector<256xf32>
    %502 = vector.shape_cast %501 : vector<256xf32> to vector<1x256xf32>
    %c253_i32 = arith.constant 253 : i32
    %503 = tpu.dynamic_rotate %469 by %c253_i32 dim 1 : vector<1x256xf32>, i32 -> vector<1x256xf32>
    %504 = arith.mulf %503, %502 : vector<1x256xf32>
    %505 = arith.addf %499, %504 : vector<1x256xf32>
    %506 = arith.negf %505 : vector<1x256xf32>
    %507 = math.exp %506 : vector<1x256xf32>
    %cst_59 = arith.constant 1.000000e+00 : f32
    %508 = vector.broadcast %cst_59 : f32 to vector<1x256xf32>
    %509 = arith.addf %508, %507 : vector<1x256xf32>
    %510 = arith.divf %508, %509 : vector<1x256xf32>
    %c0_60 = arith.constant 0 : index
    %c0_61 = arith.constant 0 : index
    %c0_62 = arith.constant 0 : index
    %511 = vector.load %arg6[%c0_60, %c0_61, %c0_62] : memref<1x16x256xf32, #tpu.memory_space<vmem>>, vector<1x16x256xf32>
    %512 = vector.shape_cast %510 : vector<1x256xf32> to vector<1x1x256xf32>
    %513 = vector.broadcast %512 : vector<1x1x256xf32> to vector<1x16x256xf32>
    %514 = arith.mulf %511, %513 : vector<1x16x256xf32>
    %c0_63 = arith.constant 0 : index
    %c0_64 = arith.constant 0 : index
    %c0_65 = arith.constant 0 : index
    %515 = vector.load %arg6[%c0_63, %c0_64, %c0_65] : memref<1x16x256xf32, #tpu.memory_space<vmem>>, vector<1x16x256xf32>
    tpu.vector_store %arg6[%c0_63, %c0_64, %c0_65], %514 {strides = array<i32>} : memref<1x16x256xf32, #tpu.memory_space<vmem>>, vector<1x16x256xf32>,
    return
  }
  func.func @transform_0(%arg0: i32) -> (i32, i32, i32) {
    %c0_i32 = arith.constant 0 : i32
    %c0_i32_0 = arith.constant 0 : i32
    %c0_i32_1 = arith.constant 0 : i32
    return %arg0, %c0_i32, %c0_i32_0 : i32, i32, i32
  }
  func.func @transform_1(%arg0: i32) -> (i32, i32) {
    %c0_i32 = arith.constant 0 : i32
    %c0_i32_0 = arith.constant 0 : i32
    %c0_i32_1 = arith.constant 0 : i32
    return %c0_i32, %c0_i32_0 : i32, i32
  }
  func.func @transform_2(%arg0: i32) -> (i32, i32) {
    %c0_i32 = arith.constant 0 : i32
    %c0_i32_0 = arith.constant 0 : i32
    %c0_i32_1 = arith.constant 0 : i32
    return %c0_i32, %c0_i32_0 : i32, i32
  }
  func.func @transform_3(%arg0: i32) -> (i32, i32) {
    %c0_i32 = arith.constant 0 : i32
    %c0_i32_0 = arith.constant 0 : i32
    %c0_i32_1 = arith.constant 0 : i32
    return %c0_i32, %c0_i32_0 : i32, i32
  }
  func.func @transform_4(%arg0: i32) -> i32 {
    %c0_i32 = arith.constant 0 : i32
    %c0_i32_0 = arith.constant 0 : i32
    return %c0_i32 : i32
  }
  func.func @transform_5(%arg0: i32) -> (i32, i32, i32) {
    %c0_i32 = arith.constant 0 : i32
    %c0_i32_0 = arith.constant 0 : i32
    %c0_i32_1 = arith.constant 0 : i32
    return %arg0, %c0_i32, %c0_i32_0 : i32, i32, i32
  }
}

</mosaic_0001>

<bundles_post_ra>
// kernel: tpu_custom_call.1
= control target key start
LH: loop header
LB: loop body
LE: loop exit
PB: predicated region body
PF: predicated region fallthrough
CT: control target
= control target key end

     0   :  { %s3631_s0 = inlined_call_operand.hbm [shape: f32[2,16,256], index: 0, kind: input, shape index: {}]   ;;  %s3632_s1 = inlined_call_operand.vmem [shape: f32[16,2], index: 1, kind: input, shape index: {}]   ;;  %s3633_s2 = inlined_call_operand.vmem [shape: f32[2,16], index: 2, kind: input, shape index: {}]   ;;  %s3634_s3 = inlined_call_operand.hbm [shape: f32[14,256], index: 3, kind: input, shape index: {}]   ;;  %s3635_s4 = inlined_call_operand.vmem [shape: f32[98], index: 4, kind: input, shape index: {}]   ;;  %s3636_s5 = inlined_call_operand.hbm [shape: f32[2,16,256], index: 5, kind: output, shape index: {}]  }
   0x1   :  { %3768 = sst [smem:[#allocation156_spill]] %s3631_s0 }
   0x2   :  { %3769 = sst [smem:[#allocation157_spill]] %s3632_s1 }
   0x3   :  { %3770 = sst [smem:[#allocation158_spill]] %s3633_s2 }
   0x4   :  { %3771 = sst [smem:[#allocation159_spill]] %s3634_s3 }
   0x5   :  { %3772 = sst [smem:[#allocation160_spill]] %s3635_s4 }
   0x6   :  { %3773 = sst [smem:[#allocation161_spill]] %s3636_s5 }
   0x7   :  { %10 = vsyncpa [#allocation3], 0 }
   0x8   :  { %12 = vsyncpa [#allocation3 + $0x1], 0 }
   0x9   :  { %13 = vsyncpa [#allocation7], 0 }
   0xa   :  { %14 = vsyncpa [#allocation5], 0 }
   0xb   :  { %15 = vsyncpa [#allocation4], 0 }
   0xc   :  { %17 = vsyncpa [#allocation4 + $0x1], 0  ;;  %s2030_s18 = smov 0   ;;  %s2032_s19 = smov 0  }
   0xd   :  { %s2034_s20 = smov 0   ;;  %s2036_s21 = smov 0  }
   0xe LB: > { %3774 = sst [smem:[#allocation14_spill]] %s1964_s18  ;;  %s2051_s22 = sadd.s32 4294967295, %s1976_s21   ;;  %s1976_s21 = sphi %s2036_s21, %s4266_s21   ;;  %s1972_s20 = sphi %s2034_s20, %s4269_s20   ;;  %s1968_s19 = sphi %s2032_s19, %s4268_s19   ;;  %s1964_s18 = sphi %s2030_s18, %s4267_s18  }
   0xf   : > { %3775 = sst [smem:[#allocation15_spill]] %s1968_s19  ;;  %s1589_s23 = sadd.s32 4294967294, %s1976_s21  }
  0x10   : > { %3776 = sst [smem:[#allocation16_spill]] %s1972_s20  ;;  %p43_p0 = scmp.ne.s32.totalorder %s1968_s19, %s1964_s18 }
  0x11   : > { %3777 = sst [smem:[#allocation17_spill]] %s1976_s21  ;;  %p3637_p1 = scmp.eq.s32.totalorder %s2051_s22, 0 }
  0x12   : > { %3778 = sst [smem:[#allocation18_spill]] %s2051_s22  ;;  %p157_p3 = scmp.eq.s32.totalorder %s1589_s23, 1 }
  0x13   : > { %p2060_p4 = por %p3637_p1, %p43_p0  ;;  %p1590_p5 = scmp.ge.s32.totalorder %s1976_s21, 1 }
  0x14   : > { %p2065_p6 = por %p157_p3, %p43_p0  ;;  %p164_p7 = scmp.lt.s32.totalorder %s1976_s21, 3 }
  0x15   : > { %s3779_s24 = scalar_select %p2060_p4, 1, 0 }
  0x16   : > { %s3780_s25 = scalar_select %p2065_p6, 1, 0 }
  0x17   : > { %p2070_p8 = pnand %p1590_p5, %p164_p7  ;;  %s1978_s27 = smov [#allocation6]  }
  0x18   : > { %3781 = sst [smem:[#allocation19_spill]] %s3780_s25  ;;  %s182_s28 = sshll.u32 %s1978_s27, 4  ;;  %s183_s28 = int_to_ptr.vmem [resolvable:$true] %s182_s28 }
  0x19   : > { %s3782_s26 = scalar_select %p2070_p8, 1, 0 }
  0x1a   : > { %p1744_p9 = pneg %p2070_p8  ;;  %s3783_s4 = sld [smem:[#allocation160_spill]] }
  0x1b   : > { %s3785_s3 = sld [smem:[#allocation159_spill]] }
  0x1c   : > { %p2082_p11 = pnand %p1744_p9, %p3637_p1 }
  0x1e   : > { %p1831_p13 = pneg %p2082_p11 }
  0x20   : > { %s196_s6 = sshll.u32 %s3783_s4, 4  ;;  %s2086_s6 = int_to_ptr.vmem [resolvable:$true] %s196_s6 }
  0x21   : > { %s1829_s10 = scalar_lea.hbm %s3785_s3, 512 }
  0x22   : > { %p1830_p12 = scmp.ne.s32.totalorder %s3785_s3, %s1829_s10  ;;  %p1836_p5 = scmp.lt.u32.totalorder %s1829_s10, %s3785_s3 }
  0x24   : > { %p1832_p0 = pnand %p1831_p13, %p1830_p12 }
  0x26   : > { %p1833_p3 = pneg %p1832_p0 }
  0x28   : > { %p1838_p7 = pnand %p1836_p5, %p1833_p3 }
  0x2a   : > { %1841 = shalt.err (!%p1838_p7)
}
  0x2b   : > { %s1842_s15 = scalar_lea.vmem %s183_s28, 512  ;;  %p1850_p2 = scmp.lt.s32.totalorder %s183_s28, %s183_s28 }
  0x2c   : > { %p1843_p9 = scmp.ne.s32.totalorder %s183_s28, %s1842_s15  ;;  %p1851_p6 = scmp.lt.s32.totalorder %s1842_s15, %s1842_s15 }
  0x2e   : > { %p1845_p10 = pnand %p1843_p9, %p1831_p13  ;;  %p1852_p4 = por %p1851_p6, %p1850_p2 }
  0x30   : > { %p1846_p1 = pneg %p1845_p10 }
  0x32   : > { %p1853_p8 = pnand %p1852_p4, %p1846_p1 }
  0x34   : > { %1856 = shalt.err (!%p1853_p8)
}
  0x35   : > { %s1979_s16 = smov 256   ;;  %s1980_s17 = smov 16  }
  0x36   : > { %1747 = dma.hbm_to_vmem [thread:$0]  (!%p2082_p11), %s3785_s3, 512, %s183_s28, [#allocation7], %s1979_s16, %s1979_s16, %s1980_s17  }
  0x37   : > { %s1857_s29 = scalar_lea.vmem %s2086_s6, 16  ;;  %p1865_p4 = scmp.lt.s32.totalorder %s2086_s6, %s2086_s6 }
  0x38   : > { %p1858_p10 = scmp.ne.s32.totalorder %s2086_s6, %s1857_s29  ;;  %p1866_p6 = scmp.lt.s32.totalorder %s1857_s29, %s1857_s29 }
  0x3a   : > { %p1860_p1 = pnand %p1858_p10, %p1831_p13  ;;  %p1867_p8 = por %p1866_p6, %p1865_p4 }
  0x3c   : > { %p1861_p2 = pneg %p1860_p1 }
  0x3e   : > { %p1868_p12 = pnand %p1867_p8, %p1861_p2 }
  0x40   : > { %1871 = shalt.err (!%p1868_p12)
}
  0x41   : > { %s1981_s30 = smov [#allocation8]   ;;  %s2124_s28 = sadd.s32 1, %s1976_s21  }
  0x42   : > { %1750 = dma.vmem_to_smem (!%p2082_p11), %s2086_s6, 16, %s1981_s30, [#allocation5]  }
  0x43   : > { %3786 = sst [smem:[#allocation20_spill]] %s2124_s28  ;;  %s30_s8 = sadd.s32 1, %s1972_s20 }
  0x44   : > { %s27_s9 = ssub.s32 %s1976_s21, %s2124_s28  ;;  %p37_p13 = scmp.ne.s32.totalorder %s1972_s20, %s1968_s19 }
  0x45   : > { %p28_p0 = scmp.eq.s32.totalorder %s27_s9, 0  ;;  %p38_p3 = scmp.eq.s32.totalorder %s1976_s21, 0 }
  0x46   : > { %p3787_p5 = scmp.eq.s32.totalorder %s2051_s22, 1  ;;  %p1761_p9 = scmp.lt.s32.totalorder %s1976_s21, 2 }
  0x47   : > { %s2140_s10 = scalar_select %p28_p0, %s1972_s20, %s30_s8  }
  0x48   : > { %p2134_p7 = por %p3787_p5, %p37_p13  ;;  %p39_p10 = por %p38_p3, %p37_p13 }
  0x49   : > { %3790 = sst [smem:[#allocation22_spill]] %s2140_s10  ;;  %s207_s11 = sand.u32 1, %s1972_s20  }
  0x4a   : > { %s3788_s7 = scalar_select %p2134_p7, 1, 0 }
  0x4b   : > { %s1594_s12 = sshll.u32 %s207_s11, 5  ;;  %s1710_s6 = sshll.u32 %s1976_s21, 9 }
  0x4c   : > { %3789 = sst [smem:[#allocation21_spill]] %s3788_s7  ;;  %s3791_s0 = sld [smem:[#allocation156_spill]] }
  0x4d   : > { %s211_s23 = scalar_lea.vmem [#allocation2], %s1594_s12  ;;  %p2151_p11 = pnand %p1761_p9, %p39_p10 }
  0x4e   : > { %s218_s27 = sshll.u32 %s211_s23, 4  ;;  %s2155_s30 = scalar_lea.sflag [#allocation3], %s207_s11  ;;  %s2149_s27 = int_to_ptr.vmem [resolvable:$true] %s218_s27 }
  0x4f   : > { %p1874_p2 = pneg %p2151_p11 }
  0x52   : > { %s2147_s15 = scalar_lea.hbm %s3791_s0, %s1710_s6  ;;  %s1877_s6 = scalar_lea.hbm %s3791_s0, 1024 }
  0x53   : > { %s1872_s8 = scalar_lea.hbm %s2147_s15, 512  ;;  %p1878_p8 = scmp.lt.u32.totalorder %s2147_s15, %s3791_s0 }
  0x54   : > { %p1873_p1 = scmp.ne.s32.totalorder %s2147_s15, %s1872_s8  ;;  %p1879_p12 = scmp.lt.u32.totalorder %s1877_s6, %s1872_s8 }
  0x55   : > { %p1881_p0 = scmp.lt.u32.totalorder %s1872_s8, %s2147_s15 }
  0x56   : > { %p1875_p4 = pnand %p1874_p2, %p1873_p1  ;;  %p1880_p13 = por %p1879_p12, %p1878_p8 }
  0x58   : > { %p1876_p6 = pneg %p1875_p4  ;;  %p1882_p3 = por %p1881_p0, %p1880_p13 }
  0x5a   : > { %p1883_p5 = pnand %p1882_p3, %p1876_p6 }
  0x5c   : > { %1886 = shalt.err (!%p1883_p5)
}
  0x5d   : > { %s1887_s11 = scalar_lea.vmem %s2149_s27, 512  ;;  %s1982_s23 = smov [#allocation2]  }
  0x5e   : > { %p1888_p9 = scmp.ne.s32.totalorder %s2149_s27, %s1887_s11  ;;  %s1892_s9 = sshll.u32 %s1982_s23, 4  ;;  %s1893_s9 = int_to_ptr.vmem [resolvable:$false] %s1892_s9 }
  0x5f   : > { %s1894_s12 = scalar_lea.vmem %s1893_s9, 1024  ;;  %p1895_p4 = scmp.lt.s32.totalorder %s2149_s27, %s1893_s9 }
  0x60   : > { %p1890_p10 = pnand %p1888_p9, %p1874_p2  ;;  %p1896_p8 = scmp.lt.s32.totalorder %s1894_s12, %s1887_s11 }
  0x62   : > { %p1891_p1 = pneg %p1890_p10  ;;  %p1897_p12 = por %p1896_p8, %p1895_p4 }
  0x64   : > { %p1898_p13 = pnand %p1897_p12, %p1891_p1 }
  0x66   : > { %1901 = shalt.err (!%p1898_p13)
}
  0x67   : > { %1754 = dma.hbm_to_vmem [thread:$0]  (!%p2151_p11), %s2147_s15, 512, %s2149_s27, %s2155_s30, %s1979_s16, %s1979_s16, %s1980_s17  }
  0x68   : > { %p3793_p2 = scmp.ne.s32.totalorder %s3782_s26, 0 }
  0x6a   : > { %230 = sbr.rel (%p3793_p2) target bundleno = 1294 (0x50e), region = 40 }
  0x71   : > { %s2189_s8 = sand.u32 1, %s1968_s19   ;;  %p3795_p6 = scmp.ne.s32.totalorder %s3779_s24, 0 }
  0x72   : > { %3794 = sst [smem:[#allocation23_spill]] %s2189_s8  ;;  %s3641_s6 = sshll.u32 %s2189_s8, 5 }
  0x73   : > { %s233_s13 = scalar_lea.sflag [#allocation3], %s2189_s8  ;;  %s236_s29 = scalar_lea.vmem [#allocation2], %s3641_s6 }
  0x74   : > { %1947 = dma.done.wait (%p3795_p6), %s233_s13, 512  }
  0x75   : > { %1949 = vsyncadd (%p3795_p6), %s233_s13, 4294966784  ;;  %p3796_p11 = scmp.eq.s32.totalorder %s2051_s22, 0 }
  0x77   : > { %1951 = dma.done.wait (%p3796_p11), [#allocation7], 512   ;;  %p3797_p0 = pmov %p3796_p11 }
  0x79   : > { %1953 = vsyncadd (%p3797_p0), [#allocation7], 4294966784  ;;  %p3798_p3 = pmov %p3797_p0 }
  0x7a   : > { %p3799_p5 = pmov %p3797_p0 }
  0x7b   : > { %1955 = dma.done.wait (%p3798_p3), [#allocation5], 16  }
  0x7c   : > { %1957 = vsyncadd (%p3799_p5), [#allocation5], 4294967280 }
  0x7d   : > { %249 = sfence }
  0x7e   : > { %v2207_v0 = vld [vmem:[%s236_s29] sm:$0xff]  ;;  %v2209_v1 = vld [vmem:[%s236_s29 + $0x8] sm:$0xff]  ;;  %v2211_v2 = vld [vmem:[%s236_s29 + $0x10] sm:$0xff]  ;;  %s3800_s1 = sld [smem:[#allocation157_spill]]  ;;  %v1983_v11 = vmov 0.0|0.0   ;;  %vm1984_vm0 = vmmov 0   ;;  %v293_v13 = vlaneseq }
  0x7f   : > { %v285_v3 = vmax.f32 %v2207_v0, %v2209_v1  ;;  %v276_v4 = vadd.f32 %v2209_v1, %v2207_v0  ;;  %v2217_v5 = vld [vmem:[%s236_s29 + $0x18] sm:$0xff]  ;;  %1729 = vmatprep.subr.bf16.mxu0 %v1983_v11  ;;  %v1985_v12 = vmov 0.0   ;;  %vm304_vm1 = vcmask 130112   ;;  %s3801_s2 = sld [smem:[#allocation158_spill]]  ;;  %s1986_s30 = smov 48  }
  0x80   : > { %v288_v6 = vmax.f32 %v2211_v2, %v2217_v5  ;;  %v279_v7 = vadd.f32 %v2217_v5, %v2211_v2  ;;  %1721 = vmatprep.mubr.msk.f32.mxu0 %vm1984_vm0, %v1985_v12  ;;  %1724 = vmatprep.subr.mxu1 %v1985_v12  ;;  %v2229_v14 = vand.u32 127, %v293_v13  ;;  %v2232_v16 = vshrl.u32 %v293_v13, 7  ;;  %s1987_s14 = smov 32   ;;  %s3640_s11 = smov 16  }
  0x81   : > { %286 = vmax.xlane.f32.xlu1 %v285_v3  ;;  %277 = vadd.xlane.f32.xlu0 %v276_v4  ;;  %vm319_vm2 = vcmask 1040384   ;;  %vm323_vm3 = vcmask 130048   ;;  %vm403_vm4 = vcmask 1041408   ;;  %vm399_vm5 = vcmask 15360   ;;  %s1989_s23 = smov 112   ;;  %s1990_s9 = smov 96  }
  0x82   : > { %1726 = vmatprep.mubr.msk.f32.mxu1 %vm1984_vm0, %v1985_v12  ;;  %v299_v15 = vadd.s32 4294967288, %v2229_v14  ;;  %v297_v20 = vsub.s32 %v2229_v14, %v2232_v16  ;;  %v2241_v43 = vsub.s32 0, %v2232_v16  ;;  %s1991_s12 = smov 80   ;;  %s2300_s13 = sld [smem:[#allocation8 + $0x46]]  ;;  %vm644_vm6 = vcmp.lt.s32.totalorder %v2229_v14, 48 }
  0x83   : > { %s2302_s29 = sld [smem:[#allocation8 + $0x15]]  ;;  %s2304_s24 = sld [smem:[#allocation8 + $0x47]]  ;;  %vm744_vm7 = vcmp.lt.s32.totalorder %v2229_v14, 32  ;;  %vm844_vm8 = vcmp.lt.s32.totalorder %v2229_v14, 16  ;;  %vm1014_vm9 = vcmp.lt.s32.totalorder %v2229_v14, 112  ;;  %vm1114_vm10 = vcmp.lt.s32.totalorder %v2229_v14, 96 }
  0x84   : > { %v321_v8 = vld [vmem:[%s3800_s1] sm:$0xff]  ;;  %v322_v9 = vld [vmem:[%s3800_s1 + $0x8] sm:$0xff]  ;;  %v302_v19 = vsub.s32 %v299_v15, %v2232_v16  ;;  %3802 = vst [vmem:[#allocation24_spill] sm:$0xff] %v2241_v43  ;;  %s2306_s26 = sld [smem:[#allocation8 + $0x16]]  ;;  %s2308_s16 = sld [smem:[#allocation8 + $0x48]]  ;;  %vm1214_vm11 = vcmp.lt.s32.totalorder %v2229_v14, 80 }
  0x85   : > { %289 = vmax.xlane.f32.xlu1 %v288_v6  ;;  %280 = vadd.xlane.f32.xlu0 %v279_v7  ;;  %v1730_v10 = vpack.c.bf16 %v322_v9, %v321_v8  ;;  %v398_v32 = vld [vmem:[%s3801_s2] sm:$0x3]  ;;  %s2310_s17 = sld [smem:[#allocation8 + $0x17]]  ;;  %s2312_s15 = sld [smem:[#allocation8 + $0x4a]]  ;;  %vm1314_vm12 = vcmp.lt.s32.totalorder %v2229_v14, 3  ;;  %vm1338_vm13 = vcmp.lt.s32.totalorder %v2229_v14, 2 }
  0x86   : > { %1725 = vmatpush3.msk.msra.mxu1 %vm403_vm4, %v398_v32  ;;  %s2314_s27 = sld [smem:[#allocation8 + $0x19]]  ;;  %s2328_s6 = sld [smem:[#allocation8 + $0x18]]  ;;  %vm1362_vm14 = vcmp.lt.s32.totalorder %v2229_v14, 1  ;;  %vm1386_vm15 = vcmp.lt.s32.totalorder %v2229_v14, 127  ;;  %vm1410_vm0 = vcmp.lt.s32.totalorder %v2229_v14, 126 }
  0x87   : > { %1731 = vmatpush3.bf16.msra.mxu0 %v1730_v10  ;;  %s2330_s0 = sld [smem:[#allocation8 + $0x32]]  ;;  %s2332_s1 = sld [smem:[#allocation8 + $0x33]] }
  0x88   : > { %s2334_s2 = sld [smem:[#allocation8 + $0x34]]  ;;  %s2336_s3 = sld [smem:[#allocation8 + $0x35]] }
  0x89   : > { %s2338_s4 = sld [smem:[#allocation8 + $0x36]]  ;;  %s2340_s10 = sld [smem:[#allocation8 + $0x37]] }
  0x8a   : > { %s2342_s20 = sld [smem:[#allocation8 + $0x3b]]  ;;  %s2344_s19 = sld [smem:[#allocation8 + $0x38]] }
  0x8b   : > { %s2346_s28 = sld [smem:[#allocation8 + $0x3f]]  ;;  %s2348_s21 = sld [smem:[#allocation8 + $0x39]] }
  0x8c   : > { %s2350_s25 = sld [smem:[#allocation8 + $0x4d]]  ;;  %s2352_s18 = sld [smem:[#allocation8 + $0x40]] }
  0x8d   : > { %3808 = sst [smem:[#allocation30_spill]] %s2330_s0  ;;  %s2354_s5 = sld [smem:[#allocation8 + $0x4e]] }
  0x8e   : > { %3809 = sst [smem:[#allocation31_spill]] %s2332_s1  ;;  %s2356_s7 = sld [smem:[#allocation8 + $0x3a]] }
  0x8f   : > { %3810 = sst [smem:[#allocation32_spill]] %s2334_s2  ;;  %s2358_s8 = sld [smem:[#allocation8]] }
  0x90   : > { %3811 = sst [smem:[#allocation33_spill]] %s2336_s3  ;;  %s2360_s22 = sld [smem:[#allocation8 + $0x1]] }
  0x91   : > { %3812 = sst [smem:[#allocation34_spill]] %s2338_s4  ;;  %s2442_s1 = sld [smem:[#allocation8 + $0x1c]] }
  0x92   : > { %3813 = sst [smem:[#allocation35_spill]] %s2340_s10  ;;  %s2444_s3 = sld [smem:[#allocation8 + $0x1d]] }
  0x93   : > { %3814 = sst [smem:[#allocation36_spill]] %s2342_s20  ;;  %s2456_s4 = sld [smem:[#allocation8 + $0x10]] }
  0x94   : > { %3815 = sst [smem:[#allocation37_spill]] %s2344_s19  ;;  %s2458_s20 = sld [smem:[#allocation8 + $0x3d]] }
  0x95   : > { %3816 = sst [smem:[#allocation38_spill]] %s2346_s28  ;;  %s2362_s19 = sld [smem:[#allocation8 + $0x2]] }
  0x96   : > { %3817 = sst [smem:[#allocation39_spill]] %s2348_s21  ;;  %s2364_s28 = sld [smem:[#allocation8 + $0x3]] }
  0x97   : > { %3818 = sst [smem:[#allocation40_spill]] %s2350_s25  ;;  %s2366_s21 = sld [smem:[#allocation8 + $0x4]] }
  0x98   : > { %3819 = sst [smem:[#allocation41_spill]] %s2352_s18  ;;  %s2368_s25 = sld [smem:[#allocation8 + $0x5]] }
  0x99   : > { %3820 = sst [smem:[#allocation42_spill]] %s2354_s5  ;;  %s2370_s5 = sld [smem:[#allocation8 + $0x6]] }
  0x9a   : > { %3821 = sst [smem:[#allocation43_spill]] %s2356_s7  ;;  %s2372_s7 = sld [smem:[#allocation8 + $0x41]] }
  0x9b   : > { %3822 = sst [smem:[#allocation44_spill]] %s2358_s8  ;;  %s2374_s8 = sld [smem:[#allocation8 + $0x7]] }
  0x9c   : > { %3823 = sst [smem:[#allocation45_spill]] %s2360_s22  ;;  %s2376_s22 = sld [smem:[#allocation8 + $0x8]] }
  0x9d   : > { %3824 = sst [smem:[#allocation46_spill]] %s2362_s19  ;;  %s2531_s18 = sld [smem:[#allocation8 + $0x52]] }
  0x9e   : > { %3825 = sst [smem:[#allocation47_spill]] %s2364_s28  ;;  %s2381_s28 = sld [smem:[#allocation8 + $0x9]] }
  0x9f   : > { %3826 = sst [smem:[#allocation48_spill]] %s2366_s21  ;;  %s2460_s2 = sld [smem:[#allocation8 + $0x23]] }
  0xa0   : > { %3827 = sst [smem:[#allocation49_spill]] %s2368_s25  ;;  %s2383_s25 = sld [smem:[#allocation8 + $0xa]] }
  0xa1   : > { %3828 = sst [smem:[#allocation50_spill]] %s2370_s5  ;;  %s2585_s10 = sld [smem:[#allocation8 + $0x2c]] }
  0xa2   : > { %3829 = sst [smem:[#allocation51_spill]] %s2372_s7  ;;  %s2388_s7 = sld [smem:[#allocation8 + $0xb]] }
  0xa3   : > { %3830 = sst [smem:[#allocation52_spill]] %s2374_s8  ;;  %s2621_s19 = sld [smem:[#allocation8 + $0x58]] }
  0xa4   : > { %3831 = sst [smem:[#allocation53_spill]] %s2376_s22  ;;  %s2390_s22 = sld [smem:[#allocation8 + $0xc]] }
  0xa5   : > { %3833 = sst [smem:[#allocation55_spill]] %s2381_s28  ;;  %s2637_s5 = sld [smem:[#allocation8 + $0x59]] }
  0xa6   : > { %3834 = sst [smem:[#allocation56_spill]] %s2383_s25  ;;  %s2639_s21 = sld [smem:[#allocation8 + $0x50]] }
  0xa7   : > { %3846 = sst [smem:[#allocation66_spill]] %s2442_s1  ;;  %s2649_s25 = sld [smem:[#allocation8 + $0x27]] }
  0xa8   : > { %3835 = sst [smem:[#allocation57_spill]] %s2388_s7  ;;  %s2659_s28 = sld [smem:[#allocation8 + $0x14]] }
  0xa9   : > { %3847 = sst [smem:[#allocation67_spill]] %s2444_s3  ;;  %s2697_s7 = sld [smem:[#allocation8 + $0x11]] }
  0xaa   : > { %3836 = sst [smem:[#allocation58_spill]] %s2390_s22  ;;  %s2710_s8 = sld [smem:[#allocation8 + $0x61]] }
  0xab   : > { %3849 = sst [smem:[#allocation68_spill]] %s2456_s4  ;;  %s2502_s4 = sld [smem:[#allocation8 + $0x44]] }
  0xac   : > { %3850 = sst [smem:[#allocation69_spill]] %s2458_s20  ;;  %s2504_s20 = sld [smem:[#allocation8 + $0x2b]] }
  0xad   : > { %3851 = sst [smem:[#allocation70_spill]] %s2460_s2  ;;  %s2657_s22 = sld [smem:[#allocation8 + $0x2e]] }
  0xae   : > { %3868 = sst [smem:[#allocation86_spill]] %s2531_s18  ;;  %s2565_s18 = sld [smem:[#allocation8 + $0x25]] }
  0xaf   : > { %3885 = sst [smem:[#allocation98_spill]] %s2585_s10  ;;  %s2629_s10 = sld [smem:[#allocation8 + $0x20]] }
  0xb0   : > { %3894 = sst [smem:[#allocation105_spill]] %s2621_s19  ;;  %s3917_s3 = sld [smem:[#allocation98_spill]] }
  0xb1   : > { %3858 = sst [smem:[#allocation77_spill]] %s2502_s4  ;;  %s2538_s4 = sld [smem:[#allocation8 + $0x3e]] }
  0xb2   : > { %3859 = sst [smem:[#allocation78_spill]] %s2504_s20  ;;  %s2542_s20 = sld [smem:[#allocation8 + $0x5c]] }
  0xb3   : > { %3900 = sst [smem:[#allocation107_spill]] %s2637_s5  ;;  %s2713_s1 = sld [smem:[#allocation8 + $0x26]] }
  0xb4   : > { %3879 = sst [smem:[#allocation94_spill]] %s2565_s18  ;;  %s2587_s18 = sld [smem:[#allocation8 + $0x53]] }
  0xb5   : > { %3901 = sst [smem:[#allocation108_spill]] %s2639_s21  ;;  %s3929_s5 = sld [smem:[#allocation32_spill]] }
  0xb6   : > { %3903 = sst [smem:[#allocation109_spill]] %s2659_s28  ;;  %s2688_s28 = sld [smem:[#allocation8 + $0x22]] }
  0xb7   : > { %3871 = sst [smem:[#allocation88_spill]] %s2538_s4  ;;  %s3928_s21 = sld [smem:[#allocation31_spill]] }
  0xb8   : > { %3872 = sst [smem:[#allocation89_spill]] %s2542_s20  ;;  %s2567_s20 = sld [smem:[#allocation8 + $0x45]] }
  0xb9   : > { %3921 = sst [smem:[#allocation98_spill]] %s2710_s8  ;;  %s3934_s19 = sld [smem:[#allocation35_spill]] }
  0xba   : > { %s3953_s8 = sld [smem:[#allocation43_spill]] }
 0x10e   : > { %v287_v17 = vpop.xlane.xlu1 %286  ;;  %v278_v18 = vpop.xlane.xlu0 %277 }
 0x10f   : > { %v283_v21 = vmul.f32 0.00390625, %v278_v18  ;;  %v312_v26 = vrot.slane %v287_v17, %v297_v20 }
 0x111   : > { %v298_v27 = vrot.slane %v283_v21, %v297_v20  ;;  %v639_v20 = vld [vmem:[#allocation6] ss:$8 sm:$0x3]  ;;  %v2379_v21 = vsub.s32 1, %v2232_v16  ;;  %v948_v16 = vstv %s2306_s26  ;;  %s2409_s26 = sld [smem:[#allocation8 + $0xf]] }
 0x112   : > { %v290_v22 = vpop.xlane.xlu1 %289  ;;  %v281_v23 = vpop.xlane.xlu0 %280 }
 0x113   : > { %v316_v24 = vrot.slane %v290_v22, %v302_v19  ;;  %v284_v25 = vmul.f32 0.00390625, %v281_v23  ;;  %3832 = vst [vmem:[#allocation54_spill] sm:$0xff] %v2379_v21  ;;  %v938_v22 = vstv %s2302_s29  ;;  %v943_v23 = vstv %s2300_s13  ;;  %s2396_s13 = sld [smem:[#allocation8 + $0xd]]  ;;  %s2398_s29 = sld [smem:[#allocation8 + $0x4f]] }
 0x115   : > { %v303_v28 = vrot.slane %v284_v25, %v302_v19  ;;  %v317_v29 = vsel %vm304_vm1, %v316_v24, %v312_v26  ;;  %v953_v24 = vstv %s2304_s24  ;;  %v739_v25 = vld [vmem:[#allocation6 + $0x1] ss:$8 sm:$0x3]  ;;  %v839_v26 = vld [vmem:[#allocation6 + $0x2] ss:$8 sm:$0x3] }
 0x116   : > { %s2407_s24 = sld [smem:[#allocation8 + $0xe]] }
 0x117   : > { %v305_v30 = vsel %vm304_vm1, %v303_v28, %v298_v27  ;;  %v958_v27 = vstv %s2310_s17  ;;  %v963_v28 = vstv %s2308_s16  ;;  %3840 = sst [smem:[#allocation62_spill]] %s2409_s26  ;;  %s2420_s16 = sld [smem:[#allocation8 + $0x54]]  ;;  %vm1434_vm1 = vcmp.lt.s32.totalorder %v2229_v14, 125 }
 0x118   : > { %v320_v31 = vsel %vm319_vm2, %v305_v30, %v317_v29  ;;  %v983_v29 = vstv %s2312_s15  ;;  %v1009_v30 = vld [vmem:[#allocation6 + $0x4] ss:$8 sm:$0x3]  ;;  %s2422_s17 = sld [smem:[#allocation8 + $0x3c]]  ;;  %s2430_s26 = sld [smem:[#allocation8 + $0x43]] }
 0x119   : > { %1722 = vmatmul.mubr.msk.f32.vlgmr.msra.gmra.mrb[0].mxu0 %vm323_vm3, %v320_v31  ;;  %3837 = sst [smem:[#allocation59_spill]] %s2396_s13  ;;  %v978_v31 = vstv %s2314_s27  ;;  %s2480_s27 = sld [smem:[#allocation8 + $0x24]] }
 0x11a   : > { %3838 = sst [smem:[#allocation60_spill]] %s2398_s29  ;;  %s2428_s29 = sld [smem:[#allocation8 + $0x55]] }
 0x11b   : > { %s2623_s15 = sld [smem:[#allocation8 + $0x13]]  ;;  %s2651_s13 = sld [smem:[#allocation8 + $0x21]] }
 0x11c   : > { %3839 = sst [smem:[#allocation61_spill]] %s2407_s24  ;;  %s2488_s24 = sld [smem:[#allocation8 + $0x56]] }
 0x11d   : > { %3841 = sst [smem:[#allocation63_spill]] %s2420_s16  ;;  %s2669_s16 = sld [smem:[#allocation8 + $0x28]] }
 0x11e   : > { %3842 = sst [smem:[#allocation64_spill]] %s2422_s17  ;;  %s3913_s17 = sld [smem:[#allocation86_spill]] }
 0x11f   : > { %3853 = sst [smem:[#allocation72_spill]] %s2480_s27  ;;  %s3923_s27 = sld [smem:[#allocation109_spill]] }
 0x120   : > { %3844 = sst [smem:[#allocation65_spill]] %s2428_s29  ;;  %s2671_s29 = sld [smem:[#allocation8 + $0x5a]] }
 0x121   : > { %3896 = sst [smem:[#allocation106_spill]] %s2623_s15  ;;  %s3935_s15 = sld [smem:[#allocation36_spill]] }
 0x122   : > { %3854 = sst [smem:[#allocation73_spill]] %s2488_s24  ;;  %s2507_s24 = sld [smem:[#allocation8 + $0x1e]] }
 0x123   : > { %3906 = sst [smem:[#allocation110_spill]] %s2669_s16  ;;  %s3914_s16 = sld [smem:[#allocation88_spill]] }
 0x126   : > { %3907 = sst [smem:[#allocation111_spill]] %s2671_s29  ;;  %s2685_s29 = sld [smem:[#allocation8 + $0x60]] }
 0x127   : > { %s3925_s2 = sld [smem:[#allocation111_spill]] }
 0x128   : > { %3860 = sst [smem:[#allocation79_spill]] %s2507_s24  ;;  %s2609_s24 = sld [smem:[#allocation8 + $0x12]] }
 0x12e   : > { %3891 = sst [smem:[#allocation103_spill]] %s2609_s24  ;;  %s3924_s24 = sld [smem:[#allocation110_spill]] }
 0x1ec   : > { %v393_v33 = vpop.f32.mrb[0].mxu0 }
 0x1ed   : > { %v397_v34 = vmax.f32 %v393_v33, 0.0  ;;  %v1723_v35 = vpop.f32.mrb[1].mxu0 }
 0x1ee   : > { %v2405_v35 = vrot.slane %v639_v20, %v2241_v43 }
 0x1ef   : > { %1727 = vmatmul.mubr.msk.f32.vlgmr.msra.gmra.mrb[0].mxu1 %vm399_vm5, %v397_v34 }
 0x2c2   : > { %v473_v36 = vpop.f32.mrb[0].mxu1 }
 0x2c3   : > { %v478_v37 = vrot.slane %v473_v36, 1  ;;  %v1728_v38 = vpop.f32.mrb[1].mxu1 }
 0x2c5   : > { %v480_v39 = vadd.f32 %v478_v37, %v473_v36  ;;  %v968_v37 = vstv %s2328_s6  ;;  %s2680_s6 = sld [smem:[#allocation8 + $0x2f]] }
 0x2c7   : > { %v1605_v40 = vmul.f32 -1.442695, %v480_v39  ;;  %v2415_v39 = vrot.slane %v639_v20, %v2379_v21 }
 0x2c9   : > { %1817 = vpow2.f32 %v1605_v40 }
 0x2d3   : > { %v1818_v41 = vpop.eup %1817 }
 0x2d4   : > { %v484_v42 = vadd.f32 1.0, %v1818_v41  ;;  %v683_v41 = vstv %s2330_s0  ;;  %s2472_s0 = sld [smem:[#allocation8 + $0x51]] }
 0x2d6   : > { %1819 = vrcp.f32 %v484_v42  ;;  %v3932_v42 = vstv %s3928_s21  ;;  %s3943_s21 = sld [smem:[#allocation39_spill]] }
 0x2da   : > { %3852 = sst [smem:[#allocation71_spill]] %s2472_s0 }
 0x2db   : > { %s2540_s0 = sld [smem:[#allocation8 + $0x5b]] }
 0x2e0   : > { %v1820_v44 = vpop.eup %1819 }
 0x2e1   : > { %v490_v45 = vrot.slane %v1820_v44, %v2241_v43 }
 0x2e3   : > { %496 = vbcast.lane.b32.xlu1 %v490_v45, 264  ;;  %492 = vbcast.lane.b32.xlu0 %v490_v45, 256 }
 0x355   : > { %v497_v46 = vpop.permute.xlu1 %496  ;;  %v493_v47 = vpop.permute.xlu0 %492 }
 0x356   : > { %v2245_v48 = vmul.f32 %v497_v46, %v2211_v2  ;;  %v2248_v49 = vmul.f32 %v497_v46, %v2217_v5  ;;  %v2251_v50 = vmul.f32 %v493_v47, %v2207_v0  ;;  %v2254_v51 = vmul.f32 %v493_v47, %v2209_v1 }
 0x358   : > { %3803 = vst [vmem:[#allocation25_spill] sm:$0xff] %v2245_v48  ;;  %3804 = vst [vmem:[#allocation26_spill] sm:$0xff] %v2248_v49  ;;  %v510_v52 = vadd.f32 %v2245_v48, %v2251_v50  ;;  %v527_v53 = vmax.f32 %v2251_v50, %v2245_v48  ;;  %v534_v54 = vmax.f32 %v2254_v51, %v2248_v49 }
 0x359   : > { %3805 = vst [vmem:[#allocation27_spill] sm:$0xff] %v2251_v50  ;;  %3806 = vst [vmem:[#allocation28_spill] sm:$0xff] %v2254_v51  ;;  %v517_v58 = vadd.f32 %v2248_v49, %v2254_v51  ;;  %v3936_v51 = vstv %s3929_s5  ;;  %s3944_s5 = sld [smem:[#allocation38_spill]] }
 0x35a   : > { %v528_v55 = vrot.slane %v527_v53, 4  ;;  %v535_v56 = vrot.slane %v534_v54, 4  ;;  %v511_v57 = vrot.slane %v510_v52, 4 }
 0x35b   : > { %v518_v0 = vrot.slane %v517_v58, 4 }
 0x35c   : > { %v529_v59 = vmax.f32 %v527_v53, %v528_v55  ;;  %v536_v60 = vmax.f32 %v534_v54, %v535_v56  ;;  %v512_v63 = vadd.f32 %v511_v57, %v510_v52  ;;  %v2433_v52 = vrot.slane %v739_v25, %v2241_v43 }
 0x35d   : > { %v519_v6 = vadd.f32 %v518_v0, %v517_v58  ;;  %v2436_v53 = vrot.slane %v739_v25, %v2379_v21  ;;  %v2440_v55 = vrot.slane %v839_v26, %v2241_v43  ;;  %v2447_v56 = vrot.slane %v839_v26, %v2379_v21 }
 0x35e   : > { %v530_v61 = vrot.slane %v529_v59, 2  ;;  %v537_v62 = vrot.slane %v536_v60, 2  ;;  %v513_v5 = vrot.slane %v512_v63, 2  ;;  %v2450_v57 = vrot.slane %v1009_v30, %v2241_v43 }
 0x35f   : > { %v520_v10 = vrot.slane %v519_v6, 2  ;;  %v2453_v58 = vrot.slane %v1009_v30, %v2379_v21  ;;  %v1109_v30 = vld [vmem:[#allocation6 + $0x5] ss:$8 sm:$0x3] }
 0x360   : > { %v531_v1 = vmax.f32 %v529_v59, %v530_v61  ;;  %v538_v2 = vmax.f32 %v536_v60, %v537_v62  ;;  %v514_v9 = vadd.f32 %v513_v5, %v512_v63 }
 0x361   : > { %v521_v12 = vadd.f32 %v520_v10, %v519_v6 }
 0x362   : > { %v532_v3 = vrot.slane %v531_v1, 1  ;;  %v539_v4 = vrot.slane %v538_v2, 1  ;;  %v515_v11 = vrot.slane %v514_v9, 1 }
 0x363   : > { %v522_v15 = vrot.slane %v521_v12, 1 }
 0x364   : > { %v2264_v7 = vmax.f32 %v531_v1, %v532_v3  ;;  %v2266_v8 = vmax.f32 %v538_v2, %v539_v4  ;;  %v516_v13 = vadd.f32 %v515_v11, %v514_v9 }
 0x365   : > { %v523_v17 = vadd.f32 %v522_v15, %v521_v12 }
 0x366   : > { %662 = vrot.lane.b32.xlu1 %v2266_v8, %s1986_s30  ;;  %660 = vrot.lane.b32.xlu0 %v2264_v7, %s1986_s30  ;;  %v2278_v18 = vmul.f32 0.0625, %v516_v13  ;;  %v2463_v60 = vmul.f32 %v943_v23, %v2266_v8  ;;  %v2466_v61 = vmul.f32 %v943_v23, %v2264_v7  ;;  %v2470_v63 = vmul.f32 %v953_v24, %v2266_v8 }
 0x367   : > { %v2282_v19 = vmul.f32 0.0625, %v523_v17  ;;  %v2494_v5 = vmul.f32 %v953_v24, %v2264_v7  ;;  %v2500_v9 = vmul.f32 %v963_v28, %v2266_v8  ;;  %v2513_v12 = vmul.f32 %v963_v28, %v2264_v7 }
 0x368   : > { %v2478_v1 = vmul.f32 %v938_v22, %v2278_v18  ;;  %v2486_v3 = vmul.f32 %v948_v16, %v2278_v18  ;;  %v2510_v11 = vmul.f32 %v958_v27, %v2278_v18  ;;  %v2521_v15 = vmul.f32 %v983_v29, %v2266_v8 }
 0x369   : > { %v2475_v0 = vmul.f32 %v938_v22, %v2282_v19  ;;  %v2483_v2 = vmul.f32 %v948_v16, %v2282_v19  ;;  %v2497_v6 = vmul.f32 %v958_v27, %v2282_v19  ;;  %3857 = vst [vmem:[#allocation76_spill] sm:$0xff] %v2500_v9  ;;  %3863 = vst [vmem:[#allocation81_spill] sm:$0xff] %v2513_v12 }
 0x36a   : > { %762 = vrot.lane.b32.xlu1 %v2266_v8, %s1987_s14  ;;  %760 = vrot.lane.b32.xlu0 %v2264_v7, %s1987_s14  ;;  %3862 = vst [vmem:[#allocation80_spill] sm:$0xff] %v2510_v11  ;;  %v2516_v13 = vmul.f32 %v978_v31, %v2282_v19  ;;  %3865 = vst [vmem:[#allocation83_spill] sm:$0xff] %v2521_v15  ;;  %v2524_v17 = vmul.f32 %v978_v31, %v2278_v18 }
 0x36b   : > { %3856 = vst [vmem:[#allocation75_spill] sm:$0xff] %v2497_v6  ;;  %v2529_v20 = vmul.f32 %v983_v29, %v2264_v7 }
 0x36c   : > { %3864 = vst [vmem:[#allocation82_spill] sm:$0xff] %v2516_v13  ;;  %3866 = vst [vmem:[#allocation84_spill] sm:$0xff] %v2524_v17 }
 0x36d   : > { %3867 = vst [vmem:[#allocation85_spill] sm:$0xff] %v2529_v20 }
 0x36e   : > { %862 = vrot.lane.b32.xlu1 %v2266_v8, %s3640_s11  ;;  %860 = vrot.lane.b32.xlu0 %v2264_v7, %s3640_s11 }
 0x372   : > { %1032 = vrot.lane.b32.xlu1 %v2266_v8, %s1989_s23  ;;  %1030 = vrot.lane.b32.xlu0 %v2264_v7, %s1989_s23 }
 0x376   : > { %740 = vrot.lane.b32.xlu0 %v2278_v18, %s1987_s14  ;;  %640 = vrot.lane.b32.xlu1 %v2278_v18, %s1986_s30 }
 0x37a   : > { %840 = vrot.lane.b32.xlu0 %v2278_v18, %s3640_s11  ;;  %642 = vrot.lane.b32.xlu1 %v2282_v19, %s1986_s30  ;;  %s2316_s30 = sld [smem:[#allocation8 + $0x4b]] }
 0x37e   : > { %1130 = vrot.lane.b32.xlu0 %v2264_v7, %s1990_s9  ;;  %742 = vrot.lane.b32.xlu1 %v2282_v19, %s1987_s14  ;;  %s2318_s14 = sld [smem:[#allocation8 + $0x1a]] }
 0x380   : > { %v993_v33 = vstv %s2316_s30  ;;  %s2631_s30 = sld [smem:[#allocation8 + $0x42]] }
 0x381   : > { %v2547_v23 = vmul.f32 %v993_v33, %v2266_v8  ;;  %v2557_v25 = vmul.f32 %v993_v33, %v2264_v7  ;;  %v2597_v33 = vmul.f32 %v968_v37, %v2282_v19 }
 0x382   : > { %1010 = vrot.lane.b32.xlu0 %v2278_v18, %s1989_s23  ;;  %842 = vrot.lane.b32.xlu1 %v2282_v19, %s3640_s11  ;;  %s2326_s11 = sld [smem:[#allocation8 + $0x31]] }
 0x383   : > { %3873 = vst [vmem:[#allocation90_spill] sm:$0xff] %v2547_v23  ;;  %3876 = vst [vmem:[#allocation92_spill] sm:$0xff] %v2557_v25 }
 0x384   : > { %v988_v32 = vstv %s2318_s14  ;;  %3887 = vst [vmem:[#allocation100_spill] sm:$0xff] %v2597_v33  ;;  %s3910_s14 = sld [smem:[#allocation77_spill]] }
 0x385   : > { %v2536_v22 = vmul.f32 %v988_v32, %v2282_v19  ;;  %v2552_v24 = vmul.f32 %v988_v32, %v2278_v18  ;;  %v2592_v32 = vmul.f32 %v968_v37, %v2278_v18  ;;  %3911 = sst [smem:[#allocation77_spill]] %s2680_s6  ;;  %s3930_s6 = sld [smem:[#allocation33_spill]] }
 0x386   : > { %1110 = vrot.lane.b32.xlu0 %v2278_v18, %s1990_s9  ;;  %1132 = vrot.lane.b32.xlu1 %v2266_v8, %s1990_s9 }
 0x387   : > { %3870 = vst [vmem:[#allocation87_spill] sm:$0xff] %v2536_v22  ;;  %3874 = vst [vmem:[#allocation91_spill] sm:$0xff] %v2552_v24  ;;  %v3973_v22 = vstv %s3953_s8  ;;  %s3989_s8 = sld [smem:[#allocation69_spill]] }
 0x388   : > { %3807 = sst [smem:[#allocation29_spill]] %s2326_s11  ;;  %v673_v40 = vstv %s2326_s11  ;;  %3886 = vst [vmem:[#allocation99_spill] sm:$0xff] %v2592_v32 }
 0x389   : > { %s2490_s11 = sld [smem:[#allocation8 + $0x2a]] }
 0x38a   : > { %1210 = vrot.lane.b32.xlu0 %v2278_v18, %s1991_s12  ;;  %1012 = vrot.lane.b32.xlu1 %v2282_v19, %s1989_s23  ;;  %s2320_s23 = sld [smem:[#allocation8 + $0x4c]] }
 0x38e   : > { %1230 = vrot.lane.b32.xlu0 %v2264_v7, %s1991_s12  ;;  %1112 = vrot.lane.b32.xlu1 %v2282_v19, %s1990_s9  ;;  %s2322_s9 = sld [smem:[#allocation8 + $0x1b]] }
 0x38f   : > { %3855 = sst [smem:[#allocation74_spill]] %s2490_s11  ;;  %s2695_s11 = sld [smem:[#allocation8 + $0x29]] }
 0x390   : > { %v1003_v34 = vstv %s2320_s23  ;;  %s2701_s23 = sld [smem:[#allocation8 + $0x30]] }
 0x391   : > { %v2572_v27 = vmul.f32 %v1003_v34, %v2266_v8  ;;  %v2582_v29 = vmul.f32 %v1003_v34, %v2264_v7 }
 0x392   : > { %1212 = vrot.lane.b32.xlu1 %v2282_v19, %s1991_s12 }
 0x393   : > { %3880 = vst [vmem:[#allocation95_spill] sm:$0xff] %v2572_v27  ;;  %3883 = vst [vmem:[#allocation97_spill] sm:$0xff] %v2582_v29 }
 0x394   : > { %v998_v36 = vstv %s2322_s9  ;;  %s2607_s9 = sld [smem:[#allocation8 + $0x5d]] }
 0x395   : > { %v2562_v26 = vmul.f32 %v998_v36, %v2282_v19  ;;  %v2577_v28 = vmul.f32 %v998_v36, %v2278_v18  ;;  %v1209_v36 = vld [vmem:[#allocation6 + $0x6] ss:$8 sm:$0x3] }
 0x396   : > { %1232 = vrot.lane.b32.xlu1 %v2266_v8, %s1991_s12  ;;  %s2324_s12 = sld [smem:[#allocation8 + $0x49]]  ;;  %v2665_v10 = vrot.slane %v1209_v36, %v2379_v21  ;;  %3918 = sst [smem:[#allocation86_spill]] %s2701_s23 }
 0x397   : > { %3878 = vst [vmem:[#allocation93_spill] sm:$0xff] %v2562_v26  ;;  %3881 = vst [vmem:[#allocation96_spill] sm:$0xff] %v2577_v28  ;;  %v3955_v28 = vstv %s3935_s15  ;;  %s3956_s23 = sld [smem:[#allocation51_spill]] }
 0x398   : > { %s3975_s15 = sld [smem:[#allocation60_spill]] }
 0x39a   : > { %3890 = sst [smem:[#allocation102_spill]] %s2607_s9 }
 0x39b   : > { %s2677_s9 = sld [smem:[#allocation8 + $0x5f]] }
 0x39c   : > { %v973_v38 = vstv %s2324_s12  ;;  %s3919_s4 = sld [smem:[#allocation102_spill]] }
 0x39d   : > { %v2602_v34 = vmul.f32 %v973_v38, %v2264_v7  ;;  %v2614_v18 = vmul.f32 %v973_v38, %v2266_v8  ;;  %v2642_v8 = vrot.slane %v1109_v30, %v2241_v43  ;;  %v2645_v38 = vrot.slane %v1109_v30, %v2379_v21  ;;  %s2705_s12 = sld [smem:[#allocation8 + $0x1f]] }
 0x39e   : > { %v2662_v30 = vrot.slane %v1209_v36, %v2241_v43  ;;  %3922 = sst [smem:[#allocation102_spill]] %s2713_s1  ;;  %s3938_s1 = sld [smem:[#allocation37_spill]] }
 0x39f   : > { %3888 = vst [vmem:[#allocation101_spill] sm:$0xff] %v2602_v34  ;;  %3892 = vst [vmem:[#allocation104_spill] sm:$0xff] %v2614_v18 }
 0x3a3   : > { %3920 = sst [smem:[#allocation88_spill]] %s2705_s12  ;;  %s3931_s12 = sld [smem:[#allocation34_spill]] }
 0x3a4   : > { %v3960_v27 = vstv %s3938_s1  ;;  %s3967_s1 = sld [smem:[#allocation40_spill]] }
 0x3d8   : > { %v663_v19 = vpop.permute.xlu1 %662  ;;  %v661_v4 = vpop.permute.xlu0 %660 }
 0x3d9   : > { %v664_v7 = vsel %vm644_vm6, %v661_v4, %v663_v19  ;;  %v665_v31 = vsel %vm644_vm6, %v663_v19, %v661_v4 }
 0x3da   : > { %v666_v16 = vmul.f32 %v665_v31, %v2405_v35  ;;  %v667_v37 = vmul.f32 %v664_v7, %v2415_v39 }
 0x3dc   : > { %v763_v47 = vpop.permute.xlu1 %762  ;;  %v761_v46 = vpop.permute.xlu0 %760  ;;  %v2750_v44 = vmul.f32 %v673_v40, %v666_v16  ;;  %v2754_v19 = vmul.f32 %v673_v40, %v667_v37  ;;  %v2760_v54 = vmul.f32 %v683_v41, %v666_v16  ;;  %v2772_v49 = vmul.f32 %v3932_v42, %v666_v16 }
 0x3dd   : > { %v764_v7 = vsel %vm744_vm7, %v761_v46, %v763_v47  ;;  %v765_v36 = vsel %vm744_vm7, %v763_v47, %v761_v46  ;;  %v2764_v46 = vmul.f32 %v683_v41, %v667_v37  ;;  %v3933_v40 = vmov %v3932_v42 }
 0x3de   : > { %v2776_v45 = vmul.f32 %v3933_v40, %v667_v37  ;;  %v2779_v31 = vmul.f32 %v765_v36, %v2433_v52  ;;  %v767_v41 = vmul.f32 %v764_v7, %v2436_v53  ;;  %v2784_v48 = vmul.f32 %v3936_v51, %v666_v16 }
 0x3df   : > { %v3939_v42 = vstv %s3930_s6  ;;  %s3948_s6 = sld [smem:[#allocation41_spill]] }
 0x3e0   : > { %v863_v62 = vpop.permute.xlu1 %862  ;;  %v861_v59 = vpop.permute.xlu0 %860  ;;  %v2792_v50 = vmul.f32 %v3939_v42, %v666_v16  ;;  %v3941_v40 = vmov %v3939_v42  ;;  %v3945_v42 = vstv %s3931_s12  ;;  %s3962_s12 = sld [smem:[#allocation64_spill]] }
 0x3e1   : > { %v864_v47 = vsel %vm844_vm8, %v861_v59, %v863_v62  ;;  %v865_v4 = vsel %vm844_vm8, %v863_v62, %v861_v59  ;;  %v3937_v59 = vmov %v3936_v51  ;;  %v2796_v21 = vmul.f32 %v3941_v40, %v667_v37 }
 0x3e2   : > { %v2788_v62 = vmul.f32 %v3937_v59, %v667_v37  ;;  %3940 = vst [vmem:[#allocation112_spill] sm:$0xff] %v2792_v50  ;;  %v866_v18 = vmul.f32 %v865_v4, %v2440_v55  ;;  %v867_v7 = vmul.f32 %v864_v47, %v2447_v56  ;;  %v2806_v34 = vmul.f32 %v3945_v42, %v666_v16 }
 0x3e3   : > { %3942 = vst [vmem:[#allocation113_spill] sm:$0xff] %v2796_v21  ;;  %v3947_v40 = vmov %v3945_v42  ;;  %v3950_v4 = vstv %s3934_s19  ;;  %s3970_s19 = sld [smem:[#allocation42_spill]] }
 0x3e4   : > { %v1033_v36 = vpop.permute.xlu1 %1032  ;;  %v1031_v43 = vpop.permute.xlu0 %1030  ;;  %3946 = vst [vmem:[#allocation114_spill] sm:$0xff] %v2806_v34  ;;  %v2810_v33 = vmul.f32 %v3947_v40, %v667_v37  ;;  %v2814_v32 = vmul.f32 %v3950_v4, %v666_v16  ;;  %v3952_v47 = vmov %v3950_v4  ;;  %v2831_v40 = vmul.f32 %v3960_v27, %v767_v41 }
 0x3e5   : > { %v1034_v51 = vsel %vm1014_vm9, %v1031_v43, %v1033_v36  ;;  %v1035_v59 = vsel %vm1014_vm9, %v1033_v36, %v1031_v43  ;;  %v2818_v29 = vmul.f32 %v3952_v47, %v667_v37  ;;  %v2823_v43 = vmul.f32 %v3955_v28, %v2779_v31 }
 0x3e6   : > { %3949 = vst [vmem:[#allocation115_spill] sm:$0xff] %v2810_v33  ;;  %3951 = vst [vmem:[#allocation116_spill] sm:$0xff] %v2814_v32  ;;  %v3958_v36 = vmov %v3955_v28  ;;  %v3961_v16 = vmov %v3960_v27  ;;  %v2839_v37 = vmul.f32 %v1034_v51, %v2450_v57  ;;  %v2842_v28 = vmul.f32 %v1035_v59, %v2453_v58 }
 0x3e7   : > { %3954 = vst [vmem:[#allocation117_spill] sm:$0xff] %v2818_v29  ;;  %3957 = vst [vmem:[#allocation118_spill] sm:$0xff] %v2823_v43  ;;  %v2827_v42 = vmul.f32 %v3958_v36, %v767_v41  ;;  %v2836_v4 = vmul.f32 %v3961_v16, %v2779_v31  ;;  %v3968_v16 = vstv %s3944_s5  ;;  %v3971_v59 = vstv %s3948_s6  ;;  %s4019_s5 = sld [smem:[#allocation45_spill]]  ;;  %s4053_s6 = sld [smem:[#allocation55_spill]] }
 0x3e8   : > { %3963 = vst [vmem:[#allocation120_spill] sm:$0xff] %v2839_v37  ;;  %3964 = vst [vmem:[#allocation121_spill] sm:$0xff] %v2842_v28  ;;  %v741_v47 = vpop.permute.xlu0 %740  ;;  %v641_v36 = vpop.permute.xlu1 %640  ;;  %v2855_v25 = vmul.f32 %v3968_v16, %v867_v7  ;;  %v3969_v51 = vmov %v3968_v16  ;;  %v2863_v24 = vmul.f32 %v3971_v59, %v867_v7  ;;  %v3972_v23 = vmov %v3971_v59 }
 0x3e9   : > { %3959 = vst [vmem:[#allocation119_spill] sm:$0xff] %v2827_v42  ;;  %v3965_v42 = vstv %s3943_s21  ;;  %v2859_v32 = vmul.f32 %v3969_v51, %v866_v18  ;;  %v2871_v29 = vmul.f32 %v3973_v22, %v767_v41  ;;  %v3977_v16 = vmov %v3973_v22  ;;  %s3984_s21 = sld [smem:[#allocation71_spill]] }
 0x3ea   : > { %v2846_v43 = vmul.f32 %v3965_v42, %v767_v41  ;;  %v3966_v27 = vmov %v3965_v42  ;;  %v2867_v42 = vmul.f32 %v3972_v23, %v866_v18  ;;  %v2880_v17 = vmul.f32 %v3977_v16, %v2779_v31 }
 0x3eb   : > { %v2851_v26 = vmul.f32 %v3966_v27, %v2779_v31  ;;  %v3974_v27 = vstv %s3956_s23  ;;  %v3981_v59 = vstv %s3962_s12  ;;  %v3983_v23 = vstv %s2430_s26  ;;  %s3999_s26 = sld [smem:[#allocation47_spill]]  ;;  %s4013_s23 = sld [smem:[#allocation44_spill]] }
 0x3ec   : > { %v2875_v20 = vmul.f32 %v3974_v27, %v867_v7  ;;  %3978 = vst [vmem:[#allocation123_spill] sm:$0xff] %v2880_v17  ;;  %v3979_v51 = vmov %v3974_v27  ;;  %v2888_v15 = vmul.f32 %v3981_v59, %v767_v41  ;;  %v2892_v13 = vmul.f32 %v3983_v23, %v867_v7  ;;  %v841_v16 = vpop.permute.xlu0 %840  ;;  %s4059_s12 = sld [smem:[#allocation56_spill]] }
 0x3ed   : > { %v2884_v34 = vmul.f32 %v3979_v51, %v866_v18  ;;  %v3986_v22 = vmov %v3981_v59  ;;  %v3988_v12 = vmov %v3983_v23  ;;  %v643_v51 = vpop.permute.xlu1 %642  ;;  %v3991_v59 = vstv %s3967_s1  ;;  %s4064_s1 = sld [smem:[#allocation61_spill]] }
 0x3ee   : > { %3976 = vst [vmem:[#allocation122_spill] sm:$0xff] %v2875_v20  ;;  %3982 = vst [vmem:[#allocation125_spill] sm:$0xff] %v2888_v15  ;;  %v2897_v27 = vmul.f32 %v3986_v22, %v2779_v31  ;;  %v2901_v33 = vmul.f32 %v3988_v12, %v866_v18  ;;  %v2906_v11 = vmul.f32 %v3991_v59, %v2842_v28  ;;  %v3992_v23 = vmov %v3991_v59 }
 0x3ef   : > { %3980 = vst [vmem:[#allocation124_spill] sm:$0xff] %v2884_v34  ;;  %3985 = vst [vmem:[#allocation126_spill] sm:$0xff] %v2892_v13  ;;  %v2911_v13 = vmul.f32 %v3992_v23, %v2839_v37  ;;  %v3993_v22 = vstv %s3970_s19  ;;  %v645_v34 = vsel %vm644_vm6, %v641_v36, %v643_v51  ;;  %v646_v59 = vsel %vm644_vm6, %v643_v51, %v641_v36  ;;  %s4070_s19 = sld [smem:[#allocation62_spill]] }
 0x3f0   : > { %3987 = vst [vmem:[#allocation127_spill] sm:$0xff] %v2897_v27  ;;  %3990 = vst [vmem:[#allocation128_spill] sm:$0xff] %v2901_v33  ;;  %v2916_v27 = vmul.f32 %v3993_v22, %v2842_v28  ;;  %v3994_v12 = vmov %v3993_v22  ;;  %v3996_v23 = vstv %s3975_s15  ;;  %v659_v9 = vmul.f32 %v2415_v39, %v645_v34  ;;  %s4071_s15 = sld [smem:[#allocation57_spill]] }
 0x3f1   : > { %v2921_v33 = vmul.f32 %v3994_v12, %v2839_v37  ;;  %v2930_v15 = vmul.f32 %v3996_v23, %v2842_v28  ;;  %v3998_v22 = vmov %v3996_v23  ;;  %v658_v12 = vmul.f32 %v2405_v35, %v646_v59  ;;  %v2967_v59 = vpop.permute.xlu0 %1130 }
 0x3f2   : > { %v2935_v50 = vmul.f32 %v3998_v22, %v2839_v37  ;;  %v4001_v17 = vstv %s3984_s21  ;;  %v4005_v23 = vstv %s3989_s8  ;;  %v4007_v22 = vstv %s3910_s14  ;;  %s4039_s14 = sld [smem:[#allocation48_spill]]  ;;  %s4077_s21 = sld [smem:[#allocation58_spill]] }
 0x3f3   : > { %3995 = vst [vmem:[#allocation129_spill] sm:$0xff] %v2921_v33  ;;  %3997 = vst [vmem:[#allocation130_spill] sm:$0xff] %v2930_v15  ;;  %v2942_v6 = vmul.f32 %v4001_v17, %v2842_v28  ;;  %v4003_v36 = vmov %v4001_v17  ;;  %v2951_v15 = vmul.f32 %v4005_v23, %v767_v41  ;;  %v4009_v35 = vstv %s3913_s17  ;;  %s4034_s17 = sld [smem:[#allocation46_spill]]  ;;  %s4082_s8 = sld [smem:[#allocation66_spill]] }
 0x3f4   : > { %4000 = vst [vmem:[#allocation131_spill] sm:$0xff] %v2935_v50  ;;  %v2947_v51 = vmul.f32 %v4003_v36, %v2839_v37  ;;  %v2955_v50 = vmul.f32 %v4007_v22, %v867_v7  ;;  %v2960_v39 = vmul.f32 %v4009_v35, %v2842_v28  ;;  %v4011_v17 = vmov %v4005_v23  ;;  %v743_v36 = vpop.permute.xlu1 %742 }
 0x3f5   : > { %4002 = vst [vmem:[#allocation132_spill] sm:$0xff] %v2942_v6  ;;  %4006 = vst [vmem:[#allocation134_spill] sm:$0xff] %v2951_v15  ;;  %v2965_v34 = vmul.f32 %v4011_v17, %v2779_v31  ;;  %v4014_v23 = vmov %v4007_v22  ;;  %v4016_v22 = vmov %v4009_v35  ;;  %v4018_v6 = vstv %s3914_s16  ;;  %s4047_s16 = sld [smem:[#allocation50_spill]] }
 0x3f6   : > { %4004 = vst [vmem:[#allocation133_spill] sm:$0xff] %v2947_v51  ;;  %4008 = vst [vmem:[#allocation135_spill] sm:$0xff] %v2955_v50  ;;  %v2971_v51 = vmul.f32 %v4014_v23, %v866_v18  ;;  %v2976_v50 = vmul.f32 %v4016_v22, %v2839_v37  ;;  %v2980_v35 = vmul.f32 %v4018_v6, %v767_v41  ;;  %v4025_v23 = vstv %s2587_s18  ;;  %s4042_s18 = sld [smem:[#allocation49_spill]] }
 0x3f7   : > { %4010 = vst [vmem:[#allocation136_spill] sm:$0xff] %v2960_v39  ;;  %4012 = vst [vmem:[#allocation137_spill] sm:$0xff] %v2965_v34  ;;  %v4021_v39 = vstv %s2567_s20  ;;  %v4023_v34 = vstv %s3999_s26  ;;  %v4027_v22 = vmov %v4018_v6  ;;  %s4046_s20 = sld [smem:[#allocation52_spill]]  ;;  %s4084_s26 = sld [smem:[#allocation67_spill]] }
 0x3f8   : > { %4015 = vst [vmem:[#allocation138_spill] sm:$0xff] %v2971_v51  ;;  %4017 = vst [vmem:[#allocation139_spill] sm:$0xff] %v2976_v50  ;;  %v2984_v17 = vmul.f32 %v4021_v39, %v867_v7  ;;  %v699_v15 = vmul.f32 %v4023_v34, %v658_v12  ;;  %v4024_v21 = vmov %v4023_v34  ;;  %v2994_v51 = vmul.f32 %v4025_v23, %v2842_v28 }
 0x3f9   : > { %4020 = vst [vmem:[#allocation140_spill] sm:$0xff] %v2980_v35  ;;  %v700_v20 = vmul.f32 %v4024_v21, %v659_v9  ;;  %v2999_v50 = vmul.f32 %v4027_v22, %v2779_v31  ;;  %v4029_v6 = vmov %v4021_v39  ;;  %v4031_v39 = vmov %v4025_v23 }
 0x3fa   : > { %4022 = vst [vmem:[#allocation141_spill] sm:$0xff] %v2984_v17  ;;  %4026 = vst [vmem:[#allocation142_spill] sm:$0xff] %v2994_v51  ;;  %v3003_v41 = vmul.f32 %v4029_v6, %v866_v18  ;;  %v3008_v17 = vmul.f32 %v4031_v39, %v2839_v37  ;;  %v4033_v34 = vstv %s2631_s30  ;;  %v4038_v23 = vstv %s4013_s23  ;;  %s4048_s30 = sld [smem:[#allocation53_spill]]  ;;  %s4086_s23 = sld [smem:[#allocation63_spill]] }
 0x3fb   : > { %4028 = vst [vmem:[#allocation143_spill] sm:$0xff] %v2999_v50  ;;  %v3012_v21 = vmul.f32 %v4033_v34, %v866_v18  ;;  %v4036_v35 = vmov %v4033_v34  ;;  %v669_v28 = vmul.f32 %v4038_v23, %v658_v12  ;;  %v4040_v31 = vmov %v4038_v23 }
 0x3fc   : > { %4030 = vst [vmem:[#allocation144_spill] sm:$0xff] %v3003_v41  ;;  %4032 = vst [vmem:[#allocation145_spill] sm:$0xff] %v3008_v17  ;;  %v3016_v33 = vmul.f32 %v4036_v35, %v867_v7  ;;  %v670_v22 = vmul.f32 %v4040_v31, %v659_v9  ;;  %v3023_v6 = vadd.f32 %v2784_v48, %v699_v15  ;;  %v4044_v17 = vstv %s4019_s5  ;;  %v843_v48 = vpop.permute.xlu1 %842  ;;  %s4088_s5 = sld [smem:[#allocation70_spill]] }
 0x3fd   : > { %4035 = vst [vmem:[#allocation146_spill] sm:$0xff] %v3012_v21  ;;  %v3026_v39 = vadd.f32 %v2788_v62, %v700_v20  ;;  %v679_v18 = vmul.f32 %v4044_v17, %v658_v12  ;;  %v4045_v34 = vmov %v4044_v17  ;;  %v745_v35 = vsel %vm744_vm7, %v741_v47, %v743_v36 }
 0x3fe   : > { %4037 = vst [vmem:[#allocation147_spill] sm:$0xff] %v3016_v33  ;;  %4041 = vst [vmem:[#allocation148_spill] sm:$0xff] %v3023_v6  ;;  %v680_v7 = vmul.f32 %v4045_v34, %v659_v9  ;;  %v746_v23 = vsel %vm744_vm7, %v743_v36, %v741_v47  ;;  %v3040_v20 = vmul.f32 %v2436_v53, %v745_v35  ;;  %v4049_v31 = vstv %s4034_s17  ;;  %v1011_v35 = vpop.permute.xlu0 %1010  ;;  %s4091_s17 = sld [smem:[#allocation72_spill]] }
 0x3ff   : > { %4043 = vst [vmem:[#allocation149_spill] sm:$0xff] %v3026_v39  ;;  %v3037_v15 = vmul.f32 %v2433_v52, %v746_v23  ;;  %v845_v62 = vsel %vm844_vm8, %v841_v16, %v843_v48  ;;  %v846_v17 = vsel %vm844_vm8, %v843_v48, %v841_v16  ;;  %v3048_v34 = vmul.f32 %v4049_v31, %v658_v12 }
 0x400   : > { %v4050_v47 = vmov %v4049_v31  ;;  %v4051_v37 = vstv %s4039_s14  ;;  %v4054_v23 = vstv %s4042_s18  ;;  %v4058_v31 = vstv %s4046_s20  ;;  %v1133_v50 = vpop.permute.xlu1 %1132  ;;  %s4095_s14 = sld [smem:[#allocation74_spill]]  ;;  %s4096_s18 = sld [smem:[#allocation65_spill]] }
 0x401   : > { %v3052_v36 = vmul.f32 %v4050_v47, %v659_v9  ;;  %v3056_v33 = vmul.f32 %v4051_v37, %v658_v12  ;;  %v4052_v52 = vmov %v4051_v37  ;;  %v3064_v21 = vmul.f32 %v4054_v23, %v658_v12  ;;  %s4099_s20 = sld [smem:[#allocation68_spill]] }
 0x402   : > { %v3060_v53 = vmul.f32 %v4052_v52, %v659_v9  ;;  %v4056_v16 = vmov %v4054_v23  ;;  %v770_v47 = vmul.f32 %v4058_v31, %v3040_v20  ;;  %v3074_v37 = vmul.f32 %v2447_v56, %v845_v62 }
 0x403   : > { %4055 = vst [vmem:[#allocation150_spill] sm:$0xff] %v3064_v21  ;;  %v3068_v48 = vmul.f32 %v4056_v16, %v659_v9  ;;  %v4060_v51 = vstv %s4047_s16  ;;  %v4062_v41 = vmov %v4058_v31  ;;  %v4063_v23 = vstv %s4048_s30  ;;  %s4102_s16 = sld [smem:[#allocation78_spill]]  ;;  %s4105_s30 = sld [smem:[#allocation59_spill]] }
 0x404   : > { %v3078_v52 = vmul.f32 %v4060_v51, %v658_v12  ;;  %v769_v39 = vmul.f32 %v4062_v41, %v3037_v15  ;;  %v780_v6 = vmul.f32 %v4063_v23, %v3040_v20  ;;  %v3087_v16 = vmul.f32 %v2440_v55, %v846_v17 }
 0x405   : > { %4057 = vst [vmem:[#allocation151_spill] sm:$0xff] %v3068_v48  ;;  %v4065_v31 = vmov %v4060_v51  ;;  %v677_v56 = vadd.f32 %v2754_v19, %v670_v22  ;;  %v676_v12 = vadd.f32 %v2750_v44, %v669_v28  ;;  %v687_v51 = vadd.f32 %v2764_v46, %v680_v7 }
 0x406   : > { %4061 = vst [vmem:[#allocation152_spill] sm:$0xff] %v3078_v52  ;;  %v3091_v21 = vmul.f32 %v4065_v31, %v659_v9  ;;  %v4067_v41 = vmov %v4063_v23  ;;  %v4068_v52 = vstv %s4053_s6  ;;  %v686_v9 = vadd.f32 %v2760_v54, %v679_v18  ;;  %v1111_v31 = vpop.permute.xlu0 %1110  ;;  %s4107_s6 = sld [smem:[#allocation89_spill]] }
 0x407   : > { %v779_v62 = vmul.f32 %v4067_v41, %v3037_v15  ;;  %v3102_v23 = vmul.f32 %v4068_v52, %v3037_v15  ;;  %v4069_v55 = vmov %v4068_v52  ;;  %v4072_v44 = vstv %s4059_s12  ;;  %s1992_s12 = smov 3  }
 0x408   : > { %4066 = vst [vmem:[#allocation153_spill] sm:$0xff] %v3091_v21  ;;  %v3107_v17 = vmul.f32 %v4069_v55, %v3040_v20  ;;  %v3114_v19 = vmul.f32 %v4072_v44, %v3037_v15  ;;  %v4074_v46 = vmov %v4072_v44  ;;  %v772_v22 = vadd.f32 %v770_v47, %v677_v56  ;;  %v1013_v55 = vpop.permute.xlu1 %1012 }
 0x409   : > { %v3119_v28 = vmul.f32 %v4074_v46, %v3040_v20  ;;  %v4076_v7 = vstv %s4064_s1  ;;  %v1134_v41 = vsel %vm1114_vm10, %v2967_v59, %v1133_v50  ;;  %v771_v54 = vadd.f32 %v769_v39, %v676_v12  ;;  %s4117_s1 = sld [smem:[#allocation94_spill]] }
 0x40a   : > { %4073 = vst [vmem:[#allocation154_spill] sm:$0xff] %v3114_v19  ;;  %v870_v52 = vmul.f32 %v4076_v7, %v3074_v37  ;;  %v4078_v18 = vmov %v4076_v7  ;;  %v782_v19 = vadd.f32 %v780_v6, %v687_v51  ;;  %v1015_v46 = vsel %vm1014_vm9, %v1011_v35, %v1013_v55 }
 0x40b   : > { %4075 = vst [vmem:[#allocation155_spill] sm:$0xff] %v3119_v28  ;;  %v869_v44 = vmul.f32 %v4078_v18, %v3087_v16  ;;  %v1016_v47 = vsel %vm1014_vm9, %v1013_v55, %v1011_v35  ;;  %v777_v56 = vadd.f32 %v2831_v40, %v772_v22  ;;  %v4079_v7 = vstv %s4070_s19 }
 0x40c   : > { %v880_v28 = vmul.f32 %v4079_v7, %v3074_v37  ;;  %v4080_v21 = vstv %s4071_s15  ;;  %v3149_v6 = vmul.f32 %v2453_v58, %v1016_v47  ;;  %v776_v51 = vadd.f32 %v2836_v4, %v771_v54  ;;  %v1113_v4 = vpop.permute.xlu1 %1112  ;;  %s4124_s15 = sld [smem:[#allocation103_spill]] }
 0x40d   : > { %v3141_v48 = vmul.f32 %v4080_v21, %v3037_v15  ;;  %v4081_v39 = vmov %v4080_v21  ;;  %v1135_v40 = vsel %vm1114_vm10, %v1133_v50, %v2967_v59  ;;  %v872_v35 = vadd.f32 %v870_v52, %v777_v56 }
 0x40e   : > { %v3146_v12 = vmul.f32 %v4081_v39, %v3040_v20  ;;  %v787_v22 = vadd.f32 %v2846_v43, %v782_v19  ;;  %v781_v55 = vadd.f32 %v779_v62, %v686_v9  ;;  %v4083_v21 = vstv %s4077_s21  ;;  %v1211_v19 = vpop.permute.xlu0 %1210 }
 0x40f   : > { %v3159_v18 = vmul.f32 %v4083_v21, %v3037_v15  ;;  %v3162_v7 = vmul.f32 %v1134_v41, %v2642_v8  ;;  %v3165_v58 = vmul.f32 %v2450_v57, %v1015_v46  ;;  %v871_v54 = vadd.f32 %v869_v44, %v776_v51 }
 0x410   : > { %v1115_v50 = vsel %vm1114_vm10, %v1111_v31, %v1113_v4  ;;  %v1116_v43 = vsel %vm1114_vm10, %v1113_v4, %v1111_v31  ;;  %v877_v59 = vadd.f32 %v2855_v25, %v872_v35  ;;  %v882_v62 = vadd.f32 %v880_v28, %v787_v22  ;;  %v1213_v39 = vpop.permute.xlu1 %1212 }
 0x411   : > { %v3173_v9 = vmul.f32 %v1135_v40, %v2645_v38  ;;  %v4085_v57 = vstv %s4082_s8  ;;  %v876_v41 = vadd.f32 %v2859_v32, %v871_v54  ;;  %v786_v44 = vadd.f32 %v2851_v26, %v781_v55  ;;  %s4142_s8 = sld [smem:[#allocation105_spill]] }
 0x412   : > { %v1040_v52 = vmul.f32 %v4085_v57, %v3149_v6  ;;  %v3181_v46 = vmul.f32 %v2645_v38, %v1116_v43  ;;  %v942_v31 = vadd.f32 %v2475_v0, %v877_v59  ;;  %v887_v25 = vadd.f32 %v2863_v24, %v882_v62 }
 0x413   : > { %v4087_v28 = vstv %s4070_s19  ;;  %v3189_v56 = vmul.f32 %v2642_v8, %v1115_v50  ;;  %v941_v32 = vadd.f32 %v2478_v1, %v876_v41  ;;  %v4089_v26 = vmov %v4085_v57  ;;  %s4118_s19 = sld [smem:[#allocation73_spill]] }
 0x414   : > { %v879_v47 = vmul.f32 %v4087_v28, %v3087_v16  ;;  %v1039_v51 = vmul.f32 %v4089_v26, %v3165_v58  ;;  %v4090_v38 = vstv %s4084_s26  ;;  %v1215_v0 = vsel %vm1214_vm11, %v1211_v19, %v1213_v39 }
 0x415   : > { %v1050_v40 = vmul.f32 %v4090_v38, %v3149_v6  ;;  %v1216_v24 = vsel %vm1214_vm11, %v1213_v39, %v1211_v19  ;;  %v947_v8 = vadd.f32 %v2463_v60, %v942_v31  ;;  %v952_v35 = vadd.f32 %v2483_v2, %v887_v25  ;;  %v1231_v2 = vpop.permute.xlu0 %1230 }
 0x416   : > { %v4092_v1 = vstv %s4086_s23  ;;  %v946_v55 = vadd.f32 %v2466_v61, %v941_v32  ;;  %v881_v54 = vadd.f32 %v879_v47, %v786_v44  ;;  %v3212_v50 = vmul.f32 %v2665_v10, %v1216_v24  ;;  %v1233_v61 = vpop.permute.xlu1 %1232  ;;  %s4234_s23 = sld [smem:[#allocation102_spill]] }
 0x417   : > { %v1145_v22 = vmul.f32 %v4092_v1, %v3173_v9  ;;  %v4093_v21 = vmov %v4092_v1  ;;  %v1042_v43 = vadd.f32 %v1040_v52, %v947_v8  ;;  %v4094_v59 = vstv %s4088_s5  ;;  %s4252_s5 = sld [smem:[#allocation23_spill]] }
 0x418   : > { %v1144_v4 = vmul.f32 %v4093_v21, %v3162_v7  ;;  %v1140_v62 = vmul.f32 %v4094_v59, %v3181_v46  ;;  %v957_v60 = vadd.f32 %v2470_v63, %v952_v35  ;;  %v3219_v19 = vmul.f32 %v2662_v30, %v1215_v0 }
 0x419   : > { %v1041_v57 = vadd.f32 %v1039_v51, %v946_v55  ;;  %v4097_v41 = vmov %v4094_v59  ;;  %v4098_v31 = vstv %s4091_s17  ;;  %v1234_v25 = vsel %vm1214_vm11, %v1231_v2, %v1233_v61 }
 0x41a   : > { %v1139_v44 = vmul.f32 %v4097_v41, %v3189_v56  ;;  %v1150_v52 = vmul.f32 %v4098_v31, %v3181_v46  ;;  %v1235_v63 = vsel %vm1214_vm11, %v1233_v61, %v1231_v2  ;;  %v1047_v28 = vadd.f32 %v2906_v11, %v1042_v43 }
 0x41b   : > { %v1052_v47 = vadd.f32 %v1050_v40, %v957_v60  ;;  %v3233_v39 = vmul.f32 %v1234_v25, %v2662_v30  ;;  %v3236_v32 = vmul.f32 %v1235_v63, %v2665_v10  ;;  %v1046_v26 = vadd.f32 %v2911_v13, %v1041_v57 }
 0x41c   : > { %v886_v51 = vadd.f32 %v2867_v42, %v881_v54  ;;  %v1142_v38 = vadd.f32 %v1140_v62, %v1047_v28  ;;  %v4100_v0 = vstv %s4095_s14  ;;  %v4101_v11 = vstv %s4096_s18 }
 0x41d   : > { %v1240_v24 = vmul.f32 %v4100_v0, %v3212_v50  ;;  %v1057_v8 = vadd.f32 %v2916_v27, %v1052_v47  ;;  %v1155_v30 = vmul.f32 %v4101_v11, %v3173_v9  ;;  %v1141_v40 = vadd.f32 %v1139_v44, %v1046_v26  ;;  %v4119_v11 = vld [vmem:[#allocation129_spill] sm:$0xff]  ;;  %s4253_s14 = sshll.u32 %s4252_s5, 5 }
 0x41e   : > { %v4103_v10 = vmov %v4100_v0  ;;  %v4104_v13 = vstv %s4084_s26  ;;  %v697_v1 = vadd.f32 %v2776_v45, %v3052_v36  ;;  %v1147_v55 = vadd.f32 %v1145_v22, %v1142_v38  ;;  %s4147_s26 = sld [smem:[#allocation106_spill]] }
 0x41f   : > { %v1239_v35 = vmul.f32 %v4103_v10, %v3219_v19  ;;  %v1049_v42 = vmul.f32 %v4104_v13, %v3165_v58  ;;  %v4106_v21 = vstv %s2540_s0  ;;  %v1152_v54 = vadd.f32 %v1150_v52, %v1057_v8  ;;  %s4116_s0 = sld [smem:[#allocation79_spill]] }
 0x420   : > { %v1245_v27 = vmul.f32 %v4106_v21, %v3236_v32  ;;  %v951_v43 = vadd.f32 %v2486_v3, %v886_v51  ;;  %v1146_v59 = vadd.f32 %v1144_v4, %v1141_v40  ;;  %v4108_v62 = vmov %v4106_v21 }
 0x421   : > { %v1244_v60 = vmul.f32 %v4108_v62, %v3233_v39  ;;  %v792_v2 = vadd.f32 %v3107_v17, %v697_v1  ;;  %v4109_v61 = vstv %s4099_s20  ;;  %v1242_v45 = vadd.f32 %v1240_v24, %v1147_v55  ;;  %v4123_v1 = vld [vmem:[#allocation122_spill] sm:$0xff]  ;;  %v4127_v62 = vld [vmem:[#allocation113_spill] sm:$0xff] }
 0x422   : > { %v890_v57 = vmul.f32 %v4109_v61, %v3074_v37  ;;  %v1157_v36 = vadd.f32 %v1155_v30, %v1152_v54  ;;  %v4110_v22 = vstv %s4102_s16  ;;  %v956_v44 = vadd.f32 %v2494_v5, %v951_v43 }
 0x423   : > { %v1250_v41 = vmul.f32 %v4110_v22, %v3212_v50  ;;  %v4111_v3 = vstv %s4077_s21  ;;  %v4112_v4 = vstv %s4105_s30  ;;  %v1241_v17 = vadd.f32 %v1239_v35, %v1146_v59  ;;  %s1993_s21 = smov 2  }
 0x424   : > { %v3273_v31 = vmul.f32 %v4111_v3, %v3040_v20  ;;  %v3278_v52 = vmul.f32 %v4112_v4, %v3037_v15  ;;  %v797_v25 = vadd.f32 %v2871_v29, %v792_v2  ;;  %v1247_v63 = vadd.f32 %v1245_v27, %v1242_v45  ;;  %v4128_v2 = vld [vmem:[#allocation75_spill] sm:$0xff] }
 0x425   : > { %v4113_v28 = vstv %s4107_s6  ;;  %v1051_v26 = vadd.f32 %v1049_v42, %v956_v44  ;;  %v4114_v5 = vstv %s4091_s17  ;;  %v4115_v38 = vmov %v4112_v4 }
 0x426   : > { %v1255_v47 = vmul.f32 %v4113_v28, %v3236_v32  ;;  %v1149_v51 = vmul.f32 %v4114_v5, %v3189_v56  ;;  %v3290_v0 = vmul.f32 %v4115_v38, %v3040_v20  ;;  %v1246_v15 = vadd.f32 %v1244_v60, %v1241_v17  ;;  %1312 = vrot.lane.b32.xlu1 %v1247_v63, %s1992_s12  ;;  %v4134_v63 = vld [vmem:[#allocation76_spill] sm:$0xff] }
 0x427   : > { %v892_v24 = vadd.f32 %v890_v57, %v797_v25  ;;  %v696_v29 = vadd.f32 %v2772_v49, %v3048_v34  ;;  %v1252_v8 = vadd.f32 %v1250_v41, %v1157_v36  ;;  %v1056_v30 = vadd.f32 %v4119_v11, %v1051_v26  ;;  %v4139_v11 = vld [vmem:[#allocation125_spill] sm:$0xff] }
 0x428   : > { %v4120_v40 = vstv %s4096_s18  ;;  %v4121_v35 = vmov %v4110_v22  ;;  %1310 = vrot.lane.b32.xlu0 %v1246_v15, %s1992_s12  ;;  %v4122_v13 = vmov %v4113_v28  ;;  %v4125_v55 = vmov %v4109_v61  ;;  %v4131_v22 = vld [vmem:[#allocation123_spill] sm:$0xff]  ;;  %s271_s18 = scalar_lea.vmem [#allocation9], %s4253_s14 }
 0x429   : > { %v1154_v10 = vmul.f32 %v4120_v40, %v3162_v7  ;;  %v1249_v20 = vmul.f32 %v4121_v35, %v3219_v19  ;;  %v1254_v42 = vmul.f32 %v4122_v13, %v3233_v39  ;;  %v897_v49 = vadd.f32 %v4123_v1, %v892_v24  ;;  %s1494_s16 = sshll.u32 %s271_s18, 4  ;;  %s3586_s16 = int_to_ptr.vmem [resolvable:$true] %s1494_s16 }
 0x42a   : > { %v791_v34 = vadd.f32 %v3102_v23, %v696_v29  ;;  %v889_v21 = vmul.f32 %v4125_v55, %v3087_v16  ;;  %v1257_v27 = vadd.f32 %v1255_v47, %v1252_v8  ;;  %v1151_v54 = vadd.f32 %v1149_v51, %v1056_v30  ;;  %v4136_v51 = vld [vmem:[#allocation112_spill] sm:$0xff] }
 0x42b   : > { %v4126_v43 = vstv %s4116_s0  ;;  %v717_v60 = vadd.f32 %v4127_v62, %v3060_v53  ;;  %v962_v61 = vadd.f32 %v4128_v2, %v897_v49  ;;  %v4129_v57 = vstv %s4117_s1  ;;  %v4149_v2 = vld [vmem:[#allocation127_spill] sm:$0xff]  ;;  %s4257_s0 = sld [smem:[#allocation161_spill]]  ;;  %s1481_s1 = scalar_lea.sflag [#allocation4], %s4252_s5 }
 0x42c   : > { %v1060_v59 = vmul.f32 %v4126_v43, %v3149_v6  ;;  %v1160_v45 = vmul.f32 %v4129_v57, %v3181_v46  ;;  %v4130_v23 = vstv %s4118_s19  ;;  %v796_v41 = vadd.f32 %v4131_v22, %v791_v34  ;;  %1336 = vrot.lane.b32.xlu1 %v1257_v27, %s1993_s21  ;;  %s1902_s19 = scalar_lea.vmem %s3586_s16, 512 }
 0x42d   : > { %v1165_v36 = vmul.f32 %v4130_v23, %v3173_v9  ;;  %v1156_v44 = vadd.f32 %v1154_v10, %v1151_v54  ;;  %v4132_v3 = vstv %s3917_s3  ;;  %v812_v53 = vadd.f32 %v3146_v12, %v717_v60  ;;  %v4140_v10 = vld [vmem:[#allocation124_spill] sm:$0xff]  ;;  %v4145_v54 = vld [vmem:[#allocation130_spill] sm:$0xff]  ;;  %s1994_s3 = smov 1   ;;  %p1903_p9 = scmp.ne.s32.totalorder %s3586_s16, %s1902_s19 }
 0x42e   : > { %v1260_v4 = vmul.f32 %v4132_v3, %v3212_v50  ;;  %v4133_v17 = vstv %s4124_s15  ;;  %v967_v28 = vadd.f32 %v4134_v63, %v962_v61  ;;  %v4135_v47 = vstv %s3919_s4  ;;  %v4155_v63 = vld [vmem:[#allocation81_spill] sm:$0xff]  ;;  %s4178_s4 = sld [smem:[#allocation107_spill]]  ;;  %s1998_s15 = smov [#allocation9]  }
 0x42f   : > { %v910_v25 = vmul.f32 %v4133_v17, %v3074_v37  ;;  %v1265_v26 = vmul.f32 %v4135_v47, %v3236_v32  ;;  %v891_v5 = vadd.f32 %v889_v21, %v796_v41  ;;  %v716_v38 = vadd.f32 %v4136_v51, %v3056_v33  ;;  %p1904_p10 = pnand %p1903_p9, %p2134_p7 }
 0x430   : > { %v1251_v15 = vadd.f32 %v1249_v20, %v1156_v44  ;;  %v4137_v24 = vmov %v4126_v43  ;;  %v4138_v12 = vmov %v4129_v57  ;;  %v817_v30 = vadd.f32 %v4139_v11, %v812_v53  ;;  %v4154_v53 = vld [vmem:[#allocation115_spill] sm:$0xff] }
 0x431   : > { %v1059_v29 = vmul.f32 %v4137_v24, %v3165_v58  ;;  %v1159_v8 = vmul.f32 %v4138_v12, %v3189_v56  ;;  %v1062_v40 = vadd.f32 %v1060_v59, %v967_v28  ;;  %v896_v35 = vadd.f32 %v4140_v10, %v891_v5  ;;  %v4146_v59 = vld [vmem:[#allocation80_spill] sm:$0xff]  ;;  %p1905_p1 = pneg %p1904_p10 }
 0x432   : > { %v811_v13 = vadd.f32 %v3141_v48, %v716_v38  ;;  %v4141_v1 = vmov %v4133_v17  ;;  %v1256_v33 = vadd.f32 %v1254_v42, %v1251_v15  ;;  %v4143_v20 = vmov %v4130_v23  ;;  %v4150_v42 = vld [vmem:[#allocation126_spill] sm:$0xff]  ;;  %v4157_v38 = vld [vmem:[#allocation82_spill] sm:$0xff] }
 0x433   : > { %v909_v49 = vmul.f32 %v4141_v1, %v3087_v16  ;;  %v1164_v34 = vmul.f32 %v4143_v20, %v3162_v7  ;;  %v4144_v55 = vmov %v4132_v3  ;;  %v912_v27 = vadd.f32 %v910_v25, %v817_v30  ;;  %v4153_v3 = vld [vmem:[#allocation151_spill] sm:$0xff]  ;;  %v4161_v1 = vld [vmem:[#allocation128_spill] sm:$0xff] }
 0x434   : > { %v1259_v21 = vmul.f32 %v4144_v55, %v3219_v19  ;;  %v1067_v43 = vadd.f32 %v4145_v54, %v1062_v40  ;;  %v961_v62 = vadd.f32 %v4146_v59, %v896_v35  ;;  %v4148_v48 = vmov %v4135_v47  ;;  %1334 = vrot.lane.b32.xlu0 %v1256_v33, %s1993_s21  ;;  %v4164_v54 = vld [vmem:[#allocation134_spill] sm:$0xff]  ;;  %s1906_s21 = sshll.u32 %s1998_s15, 4  ;;  %s1907_s21 = int_to_ptr.vmem [resolvable:$false] %s1906_s21 }
 0x435   : > { %v1264_v60 = vmul.f32 %v4148_v48, %v3233_v39  ;;  %v816_v61 = vadd.f32 %v4149_v2, %v811_v13  ;;  %v917_v57 = vadd.f32 %v4150_v42, %v912_v27  ;;  %v4151_v23 = vstv %s2629_s10  ;;  %v4166_v59 = vld [vmem:[#allocation114_spill] sm:$0xff]  ;;  %s3475_s10 = sld [smem:[#allocation8 + $0x2d]]  ;;  %p1909_p4 = scmp.lt.s32.totalorder %s3586_s16, %s1907_s21 }
 0x436   : > { %v1080_v22 = vmul.f32 %v4151_v23, %v3149_v6  ;;  %v4152_v41 = vstv %s2649_s25  ;;  %v727_v17 = vadd.f32 %v4154_v53, %v4153_v3  ;;  %v1162_v25 = vadd.f32 %v1160_v45, %v1067_v43  ;;  %v4165_v43 = vld [vmem:[#allocation150_spill] sm:$0xff]  ;;  %s1995_s25 = smov 127  }
 0x437   : > { %v1180_v44 = vmul.f32 %v4152_v41, %v3181_v46  ;;  %v966_v28 = vadd.f32 %v4155_v63, %v961_v62  ;;  %v4156_v47 = vstv %s4142_s8  ;;  %v911_v51 = vadd.f32 %v909_v49, %v816_v61  ;;  %v4162_v49 = vld [vmem:[#allocation83_spill] sm:$0xff]  ;;  %v4168_v2 = vld [vmem:[#allocation84_spill] sm:$0xff]  ;;  %s1908_s8 = scalar_lea.vmem %s1907_s21, 1024 }
 0x438   : > { %v1185_v5 = vmul.f32 %v4156_v47, %v3173_v9  ;;  %v982_v15 = vadd.f32 %v4157_v38, %v917_v57  ;;  %v4158_v24 = vstv %s2657_s22  ;;  %v822_v11 = vadd.f32 %v3273_v31, %v727_v17  ;;  %v4172_v38 = vld [vmem:[#allocation132_spill] sm:$0xff]  ;;  %s4183_s22 = sld [smem:[#allocation77_spill]]  ;;  %p1910_p8 = scmp.lt.s32.totalorder %s1908_s8, %s1902_s19 }
 0x439   : > { %v1280_v12 = vmul.f32 %v4158_v24, %v3212_v50  ;;  %v4159_v30 = vstv %s4147_s26  ;;  %v1167_v10 = vadd.f32 %v1165_v36, %v1162_v25  ;;  %v1061_v45 = vadd.f32 %v1059_v29, %v966_v28  ;;  %v4167_v36 = vld [vmem:[#allocation131_spill] sm:$0xff] }
 0x43a   : > { %v920_v40 = vmul.f32 %v4159_v30, %v3074_v37  ;;  %v4160_v35 = vstv %s2677_s9  ;;  %v916_v33 = vadd.f32 %v4161_v1, %v911_v51  ;;  %v987_v20 = vadd.f32 %v4162_v49, %v982_v15  ;;  %v4171_v28 = vld [vmem:[#allocation85_spill] sm:$0xff]  ;;  %v4177_v1 = vld [vmem:[#allocation117_spill] sm:$0xff]  ;;  %s1996_s9 = smov 126   ;;  %p1911_p12 = por %p1910_p8, %p1909_p4 }
 0x43b   : > { %v1285_v13 = vmul.f32 %v4160_v35, %v3236_v32  ;;  %v4163_v55 = vmov %v4151_v23  ;;  %v827_v31 = vadd.f32 %v4164_v54, %v822_v11  ;;  %v726_v62 = vadd.f32 %v4166_v59, %v4165_v43  ;;  %v4173_v11 = vld [vmem:[#allocation135_spill] sm:$0xff] }
 0x43c   : > { %v1079_v27 = vmul.f32 %v4163_v55, %v3165_v58  ;;  %v1262_v48 = vadd.f32 %v1260_v4, %v1167_v10  ;;  %v1066_v29 = vadd.f32 %v4167_v36, %v1061_v45  ;;  %v981_v61 = vadd.f32 %v4168_v2, %v916_v33  ;;  %v4184_v2 = vld [vmem:[#allocation90_spill] sm:$0xff]  ;;  %p1912_p13 = pnand %p1911_p12, %p1905_p1 }
 0x43d   : > { %v4169_v42 = vmov %v4152_v41  ;;  %v1082_v23 = vadd.f32 %v1080_v22, %v987_v20  ;;  %v922_v41 = vadd.f32 %v920_v40, %v827_v31  ;;  %v821_v3 = vadd.f32 %v3159_v18, %v726_v62  ;;  %v4174_v18 = vld [vmem:[#allocation137_spill] sm:$0xff]  ;;  %v4179_v20 = vld [vmem:[#allocation87_spill] sm:$0xff] }
 0x43e   : > { %v1179_v57 = vmul.f32 %v4169_v42, %v3189_v56  ;;  %v4170_v53 = vmov %v4159_v30  ;;  %v1267_v25 = vadd.f32 %v1265_v26, %v1262_v48  ;;  %v1161_v63 = vadd.f32 %v1159_v8, %v1066_v29  ;;  %v4181_v62 = vld [vmem:[#allocation133_spill] sm:$0xff] }
 0x43f   : > { %v919_v17 = vmul.f32 %v4170_v53, %v3087_v16  ;;  %v986_v4 = vadd.f32 %v4171_v28, %v981_v61  ;;  %v1184_v51 = vmul.f32 %v4156_v47, %v3162_v7  ;;  %v1087_v15 = vadd.f32 %v4172_v38, %v1082_v23  ;;  %v4186_v23 = vld [vmem:[#allocation138_spill] sm:$0xff] }
 0x440   : > { %v1279_v22 = vmul.f32 %v4158_v24, %v3219_v19  ;;  %v927_v30 = vadd.f32 %v4173_v11, %v922_v41  ;;  %v826_v40 = vadd.f32 %v4174_v18, %v821_v3  ;;  %1360 = vrot.lane.b32.xlu1 %v1267_v25, %s1994_s3  ;;  %v1166_v26 = vadd.f32 %v1164_v34, %v1161_v63  ;;  %v4188_v25 = vld [vmem:[#allocation140_spill] sm:$0xff] }
 0x441   : > { %v1081_v8 = vadd.f32 %v1079_v27, %v986_v4  ;;  %v4175_v10 = vmov %v4160_v35  ;;  %v4176_v35 = vld [vmem:[#allocation153_spill] sm:$0xff]  ;;  %v1182_v49 = vadd.f32 %v1180_v44, %v1087_v15  ;;  %v4180_v54 = vstv %s2651_s13  ;;  %v4189_v4 = vld [vmem:[#allocation91_spill] sm:$0xff]  ;;  %v4192_v11 = vld [vmem:[#allocation152_spill] sm:$0xff]  ;;  %s3477_s13 = sld [smem:[#allocation8 + $0x57]] }
 0x442   : > { %v1284_v45 = vmul.f32 %v4175_v10, %v3233_v39  ;;  %v737_v33 = vadd.f32 %v4177_v1, %v4176_v35  ;;  %v992_v55 = vadd.f32 %v4179_v20, %v927_v30  ;;  %v1090_v31 = vmul.f32 %v4180_v54, %v3149_v6  ;;  %v4193_v30 = vld [vmem:[#allocation116_spill] sm:$0xff]  ;;  %v4196_v35 = vld [vmem:[#allocation92_spill] sm:$0xff] }
 0x443   : > { %v921_v43 = vadd.f32 %v919_v17, %v826_v40  ;;  %v1261_v59 = vadd.f32 %v1259_v21, %v1166_v26  ;;  %v1086_v48 = vadd.f32 %v4181_v62, %v1081_v8  ;;  %v4182_v27 = vstv %s3923_s27  ;;  %s4218_s27 = sld [smem:[#allocation98_spill]] }
 0x444   : > { %v832_v34 = vadd.f32 %v3290_v0, %v737_v33  ;;  %v930_v36 = vmul.f32 %v4182_v27, %v3074_v37  ;;  %v1187_v29 = vadd.f32 %v1185_v5, %v1182_v49  ;;  %v997_v61 = vadd.f32 %v4184_v2, %v992_v55 }
 0x445   : > { %v4185_v44 = vstv %s3924_s24  ;;  %v926_v41 = vadd.f32 %v4186_v23, %v921_v43  ;;  %v1266_v3 = vadd.f32 %v1264_v60, %v1261_v59  ;;  %v1181_v53 = vadd.f32 %v1179_v57, %v1086_v48  ;;  %s4215_s24 = sld [smem:[#allocation86_spill]] }
 0x446   : > { %v1190_v42 = vmul.f32 %v4185_v44, %v3181_v46  ;;  %v4187_v21 = vstv %s4178_s4  ;;  %v837_v0 = vadd.f32 %v4188_v25, %v832_v34  ;;  %v1282_v63 = vadd.f32 %v1280_v12, %v1187_v29  ;;  %v4194_v12 = vld [vmem:[#allocation136_spill] sm:$0xff]  ;;  %v4203_v29 = vld [vmem:[#allocation143_spill] sm:$0xff] }
 0x447   : > { %v1195_v17 = vmul.f32 %v4187_v21, %v3173_v9  ;;  %v1092_v28 = vadd.f32 %v1090_v31, %v997_v61  ;;  %v991_v5 = vadd.f32 %v4189_v4, %v926_v41  ;;  %v4190_v47 = vmov %v4180_v54  ;;  %1358 = vrot.lane.b32.xlu0 %v1266_v3, %s1994_s3  ;;  %v4201_v34 = vld [vmem:[#allocation93_spill] sm:$0xff] }
 0x448   : > { %v1089_v38 = vmul.f32 %v4190_v47, %v3165_v58  ;;  %v1186_v15 = vadd.f32 %v1184_v51, %v1181_v53  ;;  %v4191_v24 = vstv %s4183_s22  ;;  %v932_v57 = vadd.f32 %v930_v36, %v837_v0  ;;  %v4197_v51 = vld [vmem:[#allocation141_spill] sm:$0xff]  ;;  %v4206_v3 = vld [vmem:[#allocation148_spill] sm:$0xff]  ;;  %v4207_v53 = vld [vmem:[#allocation154_spill] sm:$0xff] }
 0x449   : > { %v1290_v60 = vmul.f32 %v4191_v24, %v3212_v50  ;;  %v736_v18 = vadd.f32 %v4193_v30, %v4192_v11  ;;  %v1287_v40 = vadd.f32 %v1285_v13, %v1282_v63  ;;  %v1097_v26 = vadd.f32 %v4194_v12, %v1092_v28  ;;  %v4209_v63 = vld [vmem:[#allocation149_spill] sm:$0xff]  ;;  %v4210_v28 = vld [vmem:[#allocation155_spill] sm:$0xff]  ;;  %v4216_v12 = vld [vmem:[#allocation144_spill] sm:$0xff] }
 0x44a   : > { %v4195_v8 = vstv %s2685_s29  ;;  %v996_v1 = vadd.f32 %v4196_v35, %v991_v5  ;;  %v1281_v33 = vadd.f32 %v1279_v22, %v1186_v15  ;;  %v937_v49 = vadd.f32 %v4197_v51, %v932_v57  ;;  %v4212_v15 = vld [vmem:[#allocation118_spill] sm:$0xff] }
 0x44b   : > { %v1295_v10 = vmul.f32 %v4195_v8, %v3236_v32  ;;  %v831_v20 = vadd.f32 %v3278_v52, %v736_v18  ;;  %v4198_v55 = vmov %v4182_v27  ;;  %1384 = vrot.lane.b32.xlu1 %v1287_v40, %s1995_s25  ;;  %v1192_v13 = vadd.f32 %v1190_v42, %v1097_v26 }
 0x44c   : > { %v929_v54 = vmul.f32 %v4198_v55, %v3087_v16  ;;  %v1091_v31 = vadd.f32 %v1089_v38, %v996_v1  ;;  %v4199_v43 = vmov %v4185_v44  ;;  %v4200_v62 = vmov %v4187_v21  ;;  %v4204_v44 = vld [vmem:[#allocation139_spill] sm:$0xff] }
 0x44d   : > { %v1189_v59 = vmul.f32 %v4199_v43, %v3189_v56  ;;  %v1194_v48 = vmul.f32 %v4200_v62, %v3162_v7  ;;  %v1286_v22 = vadd.f32 %v1284_v45, %v1281_v33  ;;  %v1002_v27 = vadd.f32 %v4201_v34, %v937_v49  ;;  %v4208_v45 = vld [vmem:[#allocation95_spill] sm:$0xff]  ;;  %v4220_v49 = vld [vmem:[#allocation142_spill] sm:$0xff] }
 0x44e   : > { %v4202_v36 = vstv %s2688_s28  ;;  %v836_v2 = vadd.f32 %v4203_v29, %v831_v20  ;;  %v1197_v61 = vadd.f32 %v1195_v17, %v1192_v13  ;;  %v1096_v42 = vadd.f32 %v4204_v44, %v1091_v31  ;;  %v4229_v29 = vld [vmem:[#allocation97_spill] sm:$0xff]  ;;  %s3507_s28 = sld [smem:[#allocation8 + $0x5e]] }
 0x44f   : > { %v1100_v52 = vmul.f32 %v4202_v36, %v3149_v6  ;;  %v4205_v23 = vmov %v4191_v24  ;;  %v801_v21 = vadd.f32 %v4207_v53, %v4206_v3  ;;  %1382 = vrot.lane.b32.xlu0 %v1286_v22, %s1995_s25  ;;  %v1007_v25 = vadd.f32 %v4208_v45, %v1002_v27  ;;  %v4226_v22 = vld [vmem:[#allocation146_spill] sm:$0xff]  ;;  %v4232_v3 = vld [vmem:[#allocation99_spill] sm:$0xff] }
 0x450   : > { %v1289_v41 = vmul.f32 %v4205_v23, %v3219_v19  ;;  %v931_v0 = vadd.f32 %v929_v54, %v836_v2  ;;  %v802_v4 = vadd.f32 %v4210_v28, %v4209_v63  ;;  %v4211_v5 = vstv %s2697_s7  ;;  %s4223_s7 = sld [smem:[#allocation88_spill]]  ;;  %v4235_v63 = vld [vmem:[#allocation100_spill] sm:$0xff] }
 0x451   : > { %v899_v17 = vmul.f32 %v4211_v5, %v3087_v16  ;;  %v1292_v47 = vadd.f32 %v1290_v60, %v1197_v61  ;;  %v1191_v38 = vadd.f32 %v1189_v59, %v1096_v42  ;;  %v806_v24 = vadd.f32 %v4212_v15, %v801_v21  ;;  %v4217_v60 = vld [vmem:[#allocation119_spill] sm:$0xff] }
 0x452   : > { %v4213_v57 = vmov %v4211_v5  ;;  %v1102_v30 = vadd.f32 %v1100_v52, %v1007_v25  ;;  %v4214_v18 = vstv %s2695_s11  ;;  %v936_v16 = vadd.f32 %v4216_v12, %v931_v0  ;;  %v4230_v61 = vld [vmem:[#allocation147_spill] sm:$0xff]  ;;  %s1997_s11 = smov 125  }
 0x453   : > { %v900_v11 = vmul.f32 %v4213_v57, %v3074_v37  ;;  %v1200_v40 = vmul.f32 %v4214_v18, %v3181_v46  ;;  %v807_v26 = vadd.f32 %v4217_v60, %v802_v4  ;;  %v1297_v8 = vadd.f32 %v1295_v10, %v1292_v47  ;;  %v4221_v37 = vld [vmem:[#allocation96_spill] sm:$0xff] }
 0x454   : > { %v1196_v35 = vadd.f32 %v1194_v48, %v1191_v38  ;;  %v4219_v1 = vstv %s2685_s29  ;;  %v901_v51 = vadd.f32 %v899_v17, %v806_v24  ;;  %v1107_v20 = vadd.f32 %v4220_v49, %v1102_v30  ;;  %s4227_s29 = sld [smem:[#allocation108_spill]]  ;;  %v4237_v17 = vld [vmem:[#allocation101_spill] sm:$0xff]  ;;  %v4238_v38 = vld [vmem:[#allocation120_spill] sm:$0xff] }
 0x455   : > { %v1294_v33 = vmul.f32 %v4219_v1, %v3233_v39  ;;  %v1001_v55 = vadd.f32 %v4221_v37, %v936_v16  ;;  %v4222_v54 = vmov %v4202_v36  ;;  %v902_v31 = vadd.f32 %v900_v11, %v807_v26  ;;  %1408 = vrot.lane.b32.xlu1 %v1297_v8, %s1996_s9  ;;  %v4242_v16 = vld [vmem:[#allocation121_spill] sm:$0xff] }
 0x456   : > { %v1099_v13 = vmul.f32 %v4222_v54, %v3165_v58  ;;  %v1291_v43 = vadd.f32 %v1289_v41, %v1196_v35  ;;  %v4224_v10 = vstv %s3925_s2  ;;  %v4225_v62 = vstv %s4215_s24  ;;  %s4251_s2 = sld [smem:[#allocation18_spill]] }
 0x457   : > { %v1205_v59 = vmul.f32 %v4224_v10, %v3173_v9  ;;  %v1300_v48 = vmul.f32 %v4225_v62, %v3212_v50  ;;  %v906_v34 = vadd.f32 %v4226_v22, %v901_v51  ;;  %v1202_v27 = vadd.f32 %v1200_v40, %v1107_v20  ;;  %v4241_v40 = vld [vmem:[#allocation104_spill] sm:$0xff] }
 0x458   : > { %v4228_v36 = vstv %s4218_s27  ;;  %v1006_v2 = vadd.f32 %v4229_v29, %v1001_v55  ;;  %v907_v44 = vadd.f32 %v4230_v61, %v902_v31  ;;  %v1296_v42 = vadd.f32 %v1294_v33, %v1291_v43 }
 0x459   : > { %v1305_v52 = vmul.f32 %v4228_v36, %v3236_v32  ;;  %v4231_v23 = vmov %v4214_v18  ;;  %v971_v53 = vadd.f32 %v4232_v3, %v906_v34  ;;  %v4233_v21 = vstv %s4223_s7  ;;  %v4240_v18 = vld [vmem:[#allocation145_spill] sm:$0xff] }
 0x45a   : > { %v1199_v41 = vmul.f32 %v4231_v23, %v3189_v56  ;;  %v1069_v45 = vmul.f32 %v4233_v21, %v3165_v58  ;;  %v1207_v25 = vadd.f32 %v1205_v59, %v1202_v27  ;;  %v1101_v0 = vadd.f32 %v1099_v13, %v1006_v2  ;;  %1406 = vrot.lane.b32.xlu0 %v1296_v42, %s1996_s9 }
 0x45b   : > { %v972_v28 = vadd.f32 %v4235_v63, %v907_v44  ;;  %v4236_v4 = vmov %v4233_v21  ;;  %v976_v47 = vadd.f32 %v4237_v17, %v971_v53  ;;  %v4239_v15 = vstv %s4227_s29 }
 0x45c   : > { %v1070_v5 = vmul.f32 %v4236_v4, %v3149_v6  ;;  %v1074_v24 = vmul.f32 %v4239_v15, %v4238_v38  ;;  %v1173_v57 = vstv %s3477_s13  ;;  %v1268_v11 = vstv %s3475_s10  ;;  %s1711_s17 = sshll.u32 %s4251_s2, 9 }
 0x45d   : > { %v1302_v30 = vadd.f32 %v1300_v48, %v1207_v25  ;;  %v1106_v58 = vadd.f32 %v4240_v18, %v1101_v0  ;;  %v977_v12 = vadd.f32 %v4241_v40, %v972_v28  ;;  %v4243_v60 = vmov %v4239_v15  ;;  %v1309_v0 = vld [vmem:[#allocation6 + $0x7] ss:$8 sm:$0x3]  ;;  %s3582_s12 = scalar_lea.hbm %s4257_s0, %s1711_s17 }
 0x45e   : > { %v1075_v26 = vmul.f32 %v4243_v60, %v4242_v16  ;;  %v4244_v6 = vmov %v4224_v10  ;;  %v4245_v35 = vmov %v4225_v62  ;;  %v1071_v33 = vadd.f32 %v1069_v45, %v976_v47  ;;  %v4250_v28 = vld [vmem:[#allocation54_spill] sm:$0xff]  ;;  %v1405_v16 = vld [vmem:[#allocation6 + $0x14] ss:$8 sm:$0x3] }
 0x45f   : > { %v1204_v8 = vmul.f32 %v4244_v6, %v3162_v7  ;;  %v1299_v1 = vmul.f32 %v4245_v35, %v3219_v19  ;;  %v4246_v51 = vstv %s4234_s23  ;;  %v1307_v20 = vadd.f32 %v1305_v52, %v1302_v30 }
 0x460   : > { %v1169_v49 = vmul.f32 %v4246_v51, %v3189_v56  ;;  %v1201_v37 = vadd.f32 %v1199_v41, %v1106_v58  ;;  %v1072_v55 = vadd.f32 %v1070_v5, %v977_v12  ;;  %v4247_v54 = vmov %v4246_v51 }
 0x461   : > { %v1170_v13 = vmul.f32 %v4247_v54, %v3181_v46  ;;  %v1076_v31 = vadd.f32 %v1074_v24, %v1071_v33  ;;  %1432 = vrot.lane.b32.xlu1 %v1307_v20, %s1997_s11  ;;  %v4248_v10 = vmov %v4228_v36  ;;  %v1273_v48 = vstv %s3507_s28 }
 0x462   : > { %v1206_v43 = vadd.f32 %v1204_v8, %v1201_v37  ;;  %v1304_v59 = vmul.f32 %v4248_v10, %v3233_v39  ;;  %v1077_v62 = vadd.f32 %v1075_v26, %v1072_v55  ;;  %v1174_v34 = vmul.f32 %v1173_v57, %v3162_v7  ;;  %v1429_v10 = vld [vmem:[#allocation6 + $0x15] ss:$8 sm:$0x3] }
 0x463   : > { %v1171_v22 = vadd.f32 %v1169_v49, %v1076_v31  ;;  %v1269_v56 = vmul.f32 %v1268_v11, %v3219_v19  ;;  %v1175_v52 = vmul.f32 %v1173_v57, %v3173_v9  ;;  %v1270_v46 = vmul.f32 %v1268_v11, %v3212_v50  ;;  %v1333_v50 = vld [vmem:[#allocation6 + $0x10] ss:$8 sm:$0x3]  ;;  %v1381_v57 = vld [vmem:[#allocation6 + $0x13] ss:$8 sm:$0x3] }
 0x464   : > { %v1301_v27 = vadd.f32 %v1299_v1, %v1206_v43  ;;  %v1172_v36 = vadd.f32 %v1170_v13, %v1077_v62  ;;  %v1274_v2 = vmul.f32 %v1273_v48, %v3233_v39  ;;  %v1275_v42 = vmul.f32 %v1273_v48, %v3236_v32  ;;  %v4249_v39 = vld [vmem:[#allocation24_spill] sm:$0xff]  ;;  %v1357_v32 = vld [vmem:[#allocation6 + $0x11] ss:$8 sm:$0x3] }
 0x465   : > { %v1176_v29 = vadd.f32 %v1174_v34, %v1171_v22  ;;  %v1321_v63 = vrot.slane %v1309_v0, %v4249_v39  ;;  %v1325_v4 = vrot.slane %v1309_v0, %v4250_v28  ;;  %v1345_v15 = vrot.slane %v1333_v50, %v4249_v39 }
 0x466   : > { %v1306_v61 = vadd.f32 %v1304_v59, %v1301_v27  ;;  %v1177_v44 = vadd.f32 %v1175_v52, %v1172_v36  ;;  %v1349_v24 = vrot.slane %v1333_v50, %v4250_v28  ;;  %v1369_v18 = vrot.slane %v1357_v32, %v4249_v39 }
 0x467   : > { %v1271_v23 = vadd.f32 %v1269_v56, %v1176_v29  ;;  %v1373_v12 = vrot.slane %v1357_v32, %v4250_v28  ;;  %v1393_v6 = vrot.slane %v1381_v57, %v4249_v39  ;;  %v1397_v1 = vrot.slane %v1381_v57, %v4250_v28  ;;  %v4258_v57 = vld [vmem:[#allocation28_spill] sm:$0xff] }
 0x468   : > { %1430 = vrot.lane.b32.xlu0 %v1306_v61, %s1997_s11  ;;  %v1272_v41 = vadd.f32 %v1270_v46, %v1177_v44  ;;  %v1417_v37 = vrot.slane %v1405_v16, %v4249_v39  ;;  %v1421_v55 = vrot.slane %v1405_v16, %v4250_v28  ;;  %v1441_v27 = vrot.slane %v1429_v10, %v4249_v39 }
 0x469   : > { %v1276_v3 = vadd.f32 %v1274_v2, %v1271_v23  ;;  %v1445_v36 = vrot.slane %v1429_v10, %v4250_v28 }
 0x46a   : > { %v1277_v7 = vadd.f32 %v1275_v42, %v1272_v41 }
 0x498   : > { %v1313_v53 = vpop.permute.xlu1 %1312 }
 0x49a   : > { %v1311_v19 = vpop.permute.xlu0 %1310 }
 0x49b   : > { %v1315_v47 = vsel %vm1314_vm12, %v1311_v19, %v1313_v53  ;;  %v1316_v38 = vsel %vm1314_vm12, %v1313_v53, %v1311_v19 }
 0x49c   : > { %v1328_v58 = vmul.f32 %v1321_v63, %v1316_v38  ;;  %v1329_v40 = vmul.f32 %v1325_v4, %v1315_v47  ;;  %v4255_v47 = vld [vmem:[#allocation27_spill] sm:$0xff] }
 0x49e   : > { %v1337_v21 = vpop.permute.xlu1 %1336  ;;  %v1330_v54 = vadd.f32 %v1328_v58, %v1276_v3  ;;  %v1331_v13 = vadd.f32 %v1329_v40, %v1277_v7 }
 0x4a6   : > { %v1335_v45 = vpop.permute.xlu0 %1334 }
 0x4a7   : > { %v1339_v11 = vsel %vm1338_vm13, %v1335_v45, %v1337_v21  ;;  %v1340_v30 = vsel %vm1338_vm13, %v1337_v21, %v1335_v45 }
 0x4a8   : > { %v1352_v8 = vmul.f32 %v1345_v15, %v1340_v30  ;;  %v1353_v35 = vmul.f32 %v1349_v24, %v1339_v11  ;;  %v4256_v15 = vld [vmem:[#allocation25_spill] sm:$0xff]  ;;  %v4259_v30 = vld [vmem:[#allocation26_spill] sm:$0xff] }
 0x4aa   : > { %v1354_v48 = vadd.f32 %v1352_v8, %v1330_v54  ;;  %v1355_v22 = vadd.f32 %v1353_v35, %v1331_v13 }
 0x4b2   : > { %v1361_v25 = vpop.permute.xlu1 %1360 }
 0x4b9   : > { %v1359_v9 = vpop.permute.xlu0 %1358 }
 0x4ba   : > { %v1363_v60 = vsel %vm1362_vm14, %v1359_v9, %v1361_v25  ;;  %v1364_v26 = vsel %vm1362_vm14, %v1361_v25, %v1359_v9 }
 0x4bb   : > { %v1376_v31 = vmul.f32 %v1369_v18, %v1364_v26  ;;  %v1377_v43 = vmul.f32 %v1373_v12, %v1363_v60 }
 0x4bd   : > { %v1385_v5 = vpop.permute.xlu1 %1384  ;;  %v1378_v52 = vadd.f32 %v1376_v31, %v1354_v48  ;;  %v1379_v46 = vadd.f32 %v1377_v43, %v1355_v22 }
 0x4c1   : > { %v1383_v17 = vpop.permute.xlu0 %1382 }
 0x4c2   : > { %v1387_v49 = vsel %vm1386_vm15, %v1383_v17, %v1385_v5  ;;  %v1388_v20 = vsel %vm1386_vm15, %v1385_v5, %v1383_v17 }
 0x4c3   : > { %v1400_v34 = vmul.f32 %v1393_v6, %v1387_v49  ;;  %v1401_v56 = vmul.f32 %v1397_v1, %v1388_v20 }
 0x4c5   : > { %v1402_v44 = vadd.f32 %v1400_v34, %v1378_v52  ;;  %v1403_v42 = vadd.f32 %v1401_v56, %v1379_v46 }
 0x4c7   : > { %v1409_v33 = vpop.permute.xlu1 %1408 }
 0x4cc   : > { %v1407_v51 = vpop.permute.xlu0 %1406 }
 0x4cd   : > { %v1411_v59 = vsel %vm1410_vm0, %v1407_v51, %v1409_v33  ;;  %v1412_v62 = vsel %vm1410_vm0, %v1409_v33, %v1407_v51 }
 0x4ce   : > { %v1424_v29 = vmul.f32 %v1417_v37, %v1411_v59  ;;  %v1425_v2 = vmul.f32 %v1421_v55, %v1412_v62 }
 0x4d0   : > { %v1426_v7 = vadd.f32 %v1424_v29, %v1402_v44  ;;  %v1427_v53 = vadd.f32 %v1425_v2, %v1403_v42 }
 0x4d3   : > { %v1433_v61 = vpop.permute.xlu1 %1432 }
 0x4da   : > { %v1431_v23 = vpop.permute.xlu0 %1430 }
 0x4db   : > { %v1435_v41 = vsel %vm1434_vm1, %v1431_v23, %v1433_v61  ;;  %v1436_v3 = vsel %vm1434_vm1, %v1433_v61, %v1431_v23 }
 0x4dc   : > { %v1448_v19 = vmul.f32 %v1441_v27, %v1435_v41  ;;  %v1449_v21 = vmul.f32 %v1445_v36, %v1436_v3 }
 0x4de   : > { %v1450_v14 = vadd.f32 %v1448_v19, %v1426_v7  ;;  %v1451_v45 = vadd.f32 %v1449_v21, %v1427_v53 }
 0x4e0   : > { %v1703_v25 = vmul.f32 -1.442695, %v1450_v14  ;;  %v1704_v9 = vmul.f32 -1.442695, %v1451_v45 }
 0x4e2   : > { %1821 = vpow2.f32 %v1703_v25 }
 0x4e3   : > { %1823 = vpow2.f32 %v1704_v9 }
 0x4ec   : > { %v1822_v0 = vpop.eup %1821 }
 0x4ed   : > { %v1824_v50 = vpop.eup %1823  ;;  %v1458_v63 = vadd.f32 1.0, %v1822_v0 }
 0x4ee   : > { %v1459_v28 = vadd.f32 1.0, %v1824_v50 }
 0x4ef   : > { %1825 = vrcp.f32 %v1458_v63 }
 0x4f0   : > { %1827 = vrcp.f32 %v1459_v28 }
 0x4f9   : > { %v1826_v4 = vpop.eup %1825 }
 0x4fa   : > { %v1828_v32 = vpop.eup %1827  ;;  %v1467_v5 = vrot.slane %v1826_v4, %v4249_v39 }
 0x4fb   : > { %v1471_v17 = vrot.slane %v1828_v32, %v4249_v39 }
 0x4fc   : > { %v1472_v38 = vmul.f32 %v1467_v5, %v4255_v47  ;;  %v1474_v24 = vmul.f32 %v1467_v5, %v4256_v15 }
 0x4fd   : > { %v1473_v11 = vmul.f32 %v1471_v17, %v4258_v57  ;;  %v1475_v18 = vmul.f32 %v1471_v17, %v4259_v30 }
 0x4fe   : > { %1476 = vst [vmem:[%s271_s18] sm:$0xff] %v1472_v38  ;;  %1478 = vst [vmem:[%s271_s18 + $0x10] sm:$0xff] %v1474_v24 }
 0x4ff   : > { %1477 = vst [vmem:[%s271_s18 + $0x8] sm:$0xff] %v1473_v11  ;;  %1479 = vst [vmem:[%s271_s18 + $0x18] sm:$0xff] %v1475_v18 }
 0x500   : > { %1915 = shalt.err (!%p1912_p13)
}
 0x501   : > { %s1916_s26 = scalar_lea.hbm %s3582_s12, 512  ;;  %s1920_s22 = scalar_lea.hbm %s4257_s0, 1024 }
 0x502   : > { %p1917_p2 = scmp.ne.s32.totalorder %s3582_s12, %s1916_s26  ;;  %p1921_p0 = scmp.lt.u32.totalorder %s3582_s12, %s4257_s0 }
 0x503   : > { %p1922_p3 = scmp.lt.u32.totalorder %s1920_s22, %s1916_s26  ;;  %p1924_p9 = scmp.lt.u32.totalorder %s1916_s26, %s3582_s12 }
 0x504   : > { %p1918_p6 = pnand %p1917_p2, %p2134_p7 }
 0x505   : > { %p1923_p5 = por %p1922_p3, %p1921_p0 }
 0x506   : > { %p1919_p11 = pneg %p1918_p6 }
 0x507   : > { %p1925_p10 = por %p1924_p9, %p1923_p5 }
 0x509   : > { %p1926_p1 = pnand %p1925_p10, %p1919_p11 }
 0x50b   : > { %1929 = shalt.err (!%p1926_p1)
}
 0x50c   : > { %s1999_s13 = smov 256   ;;  %s4260_s24 = smov 16  }
 0x50d   : > { %1742 = dma.vmem_to_hbm [thread:$0]  (%p2134_p7), %s3586_s16, 512, %s3582_s12, %s1481_s1, %s1999_s13, %s1999_s13, %s4260_s24  }
 0x50e PF: > { %s4261_s27 = sld [smem:[#allocation14_spill]]  ;;  %s4262_s7 = sld [smem:[#allocation19_spill]] }
 0x50f   : > { %s4263_s9 = sld [smem:[#allocation17_spill]] }
 0x514   : > { %s1509_s29 = sand.u32 1, %s4261_s27   ;;  %p4264_p4 = scmp.ne.s32.totalorder %s4262_s7, 0 }
 0x515   : > { %p4265_p8 = scmp.ge.s32.totalorder %s4263_s9, 2  ;;  %s1510_s28 = scalar_lea.sflag [#allocation4], %s1509_s29 }
 0x517   : > { %p1756_p12 = pnand %p4265_p8, %p4264_p4 }
 0x519   : > { %1959 = dma.done.wait (!%p1756_p12), %s1510_s28, 512  }
 0x51a   : > { %1961 = vsyncadd (!%p1756_p12), %s1510_s28, 4294966784  ;;  %s4266_s21 = sld [smem:[#allocation20_spill]]  ;;  %s4267_s18 = sld [smem:[#allocation15_spill]] }
 0x51b   : > { %s4268_s19 = sld [smem:[#allocation16_spill]]  ;;  %s4269_s20 = sld [smem:[#allocation22_spill]] }
 0x520   : > { %p20_p13 = scmp.ge.s32.totalorder %s4266_s21, 4  }
 0x522   :  { %22 = sbr.rel (!%p20_p13) target bundleno = 14 (0xe), region = 105 }
 0x529   :  { %1515 = vsyncpa [#allocation3], 1 }
 0x52a   :  { %1517 = vsyncpa [#allocation3 + $0x1], 1 }
 0x52b   :  { %1518 = vsyncpa [#allocation7], 1 }
 0x52c   :  { %1519 = vsyncpa [#allocation4], 1 }
 0x52d   :  { %1521 = vsyncpa [#allocation4 + $0x1], 1 }
 0x52e   :  { %1522 = vsyncpa [#allocation5], 1 }
 0x52f   :  { %1524 = vsyncpa [#allocation5 + $0x1], 1 }

</bundles_post_ra>
